<compile_context>
chip_gen: v5e
topology: v5e:2x2
jax: 0.10.0
libtpu: 0.0.40
codegen_flags: <defaults>
</compile_context>

<pallas_src>
import functools

import numpy as np
import jax
import jax.numpy as jnp
from jax.experimental import pallas as pl
from jax.experimental.pallas import tpu as pltpu

VMEM_SPEC = pl.BlockSpec(memory_space=pltpu.MemorySpace.VMEM)
EPS = 1e-5


# -----------------------------------------------------------------------------
# Fused forward kernel: 3 matmuls + elementwise epilogues, all in VMEM.
# -----------------------------------------------------------------------------
def _biggan_fwd_kernel(cond_ref, w_all_ref, b_all_ref, w1_ref, scale2_ref,
                       shift2_ref, w2_ref, b2_ref, o_ref, *, n_lin):
    # merged cond matmul: [B,48] @ [48, 3*n_lin] -> lin | cbn_scale | cbn_shift
    cond = cond_ref[...].astype(jnp.bfloat16)
    r = jnp.dot(cond, w_all_ref[...],
                preferred_element_type=jnp.float32) + b_all_ref[...]
    # n_lin is a multiple of 128 -> these slices are lane-tile aligned (free).
    h = r[:, :n_lin]                          # bottom feature map [B, C*Hb*Wb]
    scale1 = r[:, n_lin:2 * n_lin]            # (1+gamma(cond)) * rsqrt(rv+eps)
    shift1 = r[:, 2 * n_lin:3 * n_lin]        # beta(cond) - scale * rm
    h = jnp.maximum(scale1 * h + shift1, 0.0)            # CBN + ReLU (folded)

    # nearest-2x upsample + 3x3 conv, lowered to one Toeplitz matmul
    h = jnp.dot(h.astype(jnp.bfloat16), w1_ref[...],
                preferred_element_type=jnp.float32)       # [B, C*H*W]
    h = jnp.maximum(h * scale2_ref[...] + shift2_ref[...], 0.0)  # BN+bias+ReLU

    # 3x3 conv to RGB (output columns zero-padded to a multiple of 128 lanes)
    h = jnp.dot(h.astype(jnp.bfloat16), w2_ref[...],
                preferred_element_type=jnp.float32)       # [B, pad(3*H*W)]
    o_ref[...] = jnp.tanh(h + b2_ref[...])    # unmasked lane-dense store


# -----------------------------------------------------------------------------
# One-time weight preparation (outside the hot path, plain numpy at init).
# -----------------------------------------------------------------------------
def _conv3x3_as_matrix(weight, h_in, w_in, *, upsample):
    """Lower (optional nearest-2x upsample +) 3x3 conv (pad=1, stride=1) to a
    dense matrix acting on activations laid out as [Cin*h_in*w_in] lanes
    (channel-major, row-major spatial).  Returns [Cin*HWin, Cout*HWout] f32."""
    w = np.asarray(weight, np.float32)                 # [Cout, Cin, 3, 3]
    c_out, c_in, kh, kw = w.shape
    h_out = h_in * 2 if upsample else h_in
    w_out = w_in * 2 if upsample else w_in
    mat = np.zeros((c_in * h_in * w_in, c_out * h_out * w_out), np.float32)
    ci_base = np.arange(c_in) * (h_in * w_in)
    co_base = np.arange(c_out) * (h_out * w_out)
    for i in range(h_out):
        for j in range(w_out):
            p = i * w_out + j
            for dh in range(kh):
                for dw in range(kw):
                    si, sj = i + dh - 1, j + dw - 1
                    if not (0 <= si < h_out and 0 <= sj < w_out):
                        continue                        # zero padding
                    li = si // 2 if upsample else si
                    lj = sj // 2 if upsample else sj
                    s = li * w_in + lj
                    mat[np.ix_(ci_base + s, co_base + p)] += w[:, :, dh, dw].T
    return mat


def prepare_fused_weights(p, *, ch, bottom):
    """Fold BN running stats / biases and pre-expand everything into the
    lane-dense layouts the fused kernel expects.  bf16 for MXU operands.
    The RGB output matrix / bias are zero-padded to a 128-lane multiple."""
    hw_lo = bottom * bottom
    hw_hi = (2 * bottom) ** 2
    f32 = lambda a: np.asarray(a, np.float32)

    # conditional BN (eval-mode running stats), gamma has the +1 convention:
    #   y = (1 + gamma(cond)) * (x - rm) * rsqrt(rv + eps) + beta(cond)
    rs1 = 1.0 / np.sqrt(f32(p["cbn_rv"]) + EPS)
    rm1 = f32(p["cbn_rm"])
    w_g, b_g = f32(p["cbn_gamma_w"]), f32(p["cbn_gamma_b"])
    w_b, b_b = f32(p["cbn_beta_w"]), f32(p["cbn_beta_b"])
    w_scale = w_g * rs1[None, :]
    b_scale = rs1 * (1.0 + b_g)
    w_shift = w_b - w_g * (rs1 * rm1)[None, :]
    b_shift = b_b - rm1 * rs1 * (1.0 + b_g)
    rep_lo = lambda a: np.repeat(a, hw_lo, axis=-1)     # per-channel -> per-lane
    w_all = np.concatenate([f32(p["lin_w"]), rep_lo(w_scale), rep_lo(w_shift)], 1)
    b_all = np.concatenate([f32(p["lin_b"]), rep_lo(b_scale), rep_lo(b_shift)])

    # upsample(2x nearest) + conv1 as one Toeplitz matrix
    w1 = _conv3x3_as_matrix(p["conv1_w"], bottom, bottom, upsample=True)

    # plain BN (running stats) with conv1 bias folded into the shift
    rs2 = 1.0 / np.sqrt(f32(p["bn_rv"]) + EPS)
    scale2 = f32(p["bn_gamma"]) * rs2
    shift2 = f32(p["bn_beta"]) + scale2 * (f32(p["conv1_b"]) - f32(p["bn_rm"]))
    scale2 = np.repeat(scale2, hw_hi)[None, :]
    shift2 = np.repeat(shift2, hw_hi)[None, :]

    # output 3x3 conv to RGB, zero-padded on the output-lane axis to 128k
    w2 = _conv3x3_as_matrix(p["out_w"], 2 * bottom, 2 * bottom, upsample=False)
    b2 = np.repeat(f32(p["out_b"]), hw_hi)[None, :]
    n_out = 3 * hw_hi
    n_out_pad = ((n_out + 127) // 128) * 128
    if n_out_pad != n_out:
        w2 = np.pad(w2, ((0, 0), (0, n_out_pad - n_out)))
        b2 = np.pad(b2, ((0, 0), (0, n_out_pad - n_out)))

    bf = lambda a: jnp.asarray(a, jnp.bfloat16)
    f = lambda a: jnp.asarray(a, jnp.float32)
    return dict(w_all=bf(w_all), b_all=f(b_all[None, :]), w1=bf(w1),
                scale2=f(scale2), shift2=f(shift2), w2=bf(w2), b2=f(b2),
                n_out=n_out, n_out_pad=n_out_pad)


# -----------------------------------------------------------------------------
# Synthetic BigGAN generator + ConditionedBigGAN wrapper
# -----------------------------------------------------------------------------
class SyntheticBigGAN:
    def __init__(self, params, *, dim_z, shared_dim, num_classes, ch, bottom):
        self.params = params
        self.dim_z = dim_z
        self.shared_dim = shared_dim
        self.num_classes = num_classes
        self.ch = ch
        self.bottom = bottom
        self.fused = prepare_fused_weights(params, ch=ch, bottom=bottom)

    def shared(self, classes):
        """Class embedding lookup as a gather (not a one-hot MXU matmul)."""
        return jnp.take(self.params["shared_emb"], classes, axis=0)

    def __call__(self, z, embed):
        B = z.shape[0]
        cond = jnp.concatenate(
            [z.astype(jnp.float32), embed.astype(jnp.float32)], axis=1)
        n_lin = self.ch * self.bottom * self.bottom
        fw = self.fused
        out = pl.pallas_call(
            functools.partial(_biggan_fwd_kernel, n_lin=n_lin),
            out_shape=jax.ShapeDtypeStruct((B, fw["n_out_pad"]), jnp.float32),
            in_specs=[VMEM_SPEC] * 8,
            out_specs=VMEM_SPEC,
        )(cond, fw["w_all"], fw["b_all"], fw["w1"], fw["scale2"],
          fw["shift2"], fw["w2"], fw["b2"])
        # drop the zero padding lanes (cheap XLA slice) and restore NCHW
        out = out[:, :fw["n_out"]]
        return out.reshape(B, 3, 2 * self.bottom, 2 * self.bottom)


class ConditionedBigGAN:
    """JAX/Pallas port of models/gan_load.py::ConditionedBigGAN."""

    def __init__(self, big_gan, target_classes=3):
        self.big_gan = big_gan
        # PyTorch stores an int64 non-trainable Parameter; int32 here (same
        # indexing semantics, avoids enabling x64).
        self.target_classes = jnp.asarray(target_classes, dtype=jnp.int32)
        self.dim_z = big_gan.dim_z

    def mixed_classes(self, batch_size, key=None):
        if self.target_classes.ndim == 0:
            return jnp.full((batch_size,), self.target_classes, dtype=jnp.int32)
        # TODO(synk): original uses stateful np.random.choice; here we need an
        # explicit jax.random key, so sampling is deterministic per key.
        key = jax.random.PRNGKey(0) if key is None else key
        return jax.random.choice(key, self.target_classes, shape=(batch_size,))

    def __call__(self, z, classes=None):
        if classes is None:
            classes = self.mixed_classes(z.shape[0])
        return self.big_gan(z, self.big_gan.shared(classes))


# -----------------------------------------------------------------------------
# Deterministic parameter init + pure-JAX reference for verification
# -----------------------------------------------------------------------------
def init_params(key, *, dim_z, shared_dim, num_classes, ch, bottom):
    keys = jax.random.split(key, 12)
    w = lambda k, shape: (0.1 * jax.random.normal(k, shape)).astype(jnp.float32)
    cond_dim = dim_z + shared_dim
    return dict(
        shared_emb=w(keys[0], (num_classes, shared_dim)),
        lin_w=w(keys[1], (cond_dim, ch * bottom * bottom)),
        lin_b=w(keys[2], (ch * bottom * bottom,)),
        cbn_gamma_w=w(keys[3], (cond_dim, ch)),
        cbn_gamma_b=jnp.zeros((ch,), jnp.float32),
        cbn_beta_w=w(keys[4], (cond_dim, ch)),
        cbn_beta_b=jnp.zeros((ch,), jnp.float32),
        cbn_rm=w(keys[5], (ch,)),
        cbn_rv=(1.0 + 0.1 * jnp.abs(jax.random.normal(keys[6], (ch,)))).astype(jnp.float32),
        conv1_w=w(keys[7], (ch, ch, 3, 3)),
        conv1_b=w(keys[8], (ch,)),
        bn_gamma=jnp.ones((ch,), jnp.float32),
        bn_beta=jnp.zeros((ch,), jnp.float32),
        bn_rm=w(keys[9], (ch,)),
        bn_rv=(1.0 + 0.1 * jnp.abs(jax.random.normal(keys[10], (ch,)))).astype(jnp.float32),
        out_w=w(keys[11], (3, ch, 3, 3)),
        out_b=jnp.zeros((3,), jnp.float32),
    )


def reference_forward(p, z, classes, *, ch, bottom):
    """Unfused f32 reference (plain jnp / lax) of the same generator."""
    dn = ("NCHW", "OIHW", "NCHW")
    emb = jnp.take(p["shared_emb"], classes, axis=0)
    cond = jnp.concatenate([z.astype(jnp.float32), emb], axis=1)
    B = z.shape[0]
    h = (cond @ p["lin_w"] + p["lin_b"]).reshape(B, ch, bottom, bottom)
    gamma = cond @ p["cbn_gamma_w"] + p["cbn_gamma_b"]
    beta = cond @ p["cbn_beta_w"] + p["cbn_beta_b"]
    rs1 = jax.lax.rsqrt(p["cbn_rv"] + EPS)
    xhat = (h - p["cbn_rm"][None, :, None, None]) * rs1[None, :, None, None]
    h = (1.0 + gamma)[:, :, None, None] * xhat + beta[:, :, None, None]
    h = jnp.maximum(h, 0.0)
    h = jnp.repeat(jnp.repeat(h, 2, axis=2), 2, axis=3)
    h = jax.lax.conv_general_dilated(h, p["conv1_w"], (1, 1), "SAME",
                                     dimension_numbers=dn)
    h = h + p["conv1_b"][None, :, None, None]
    rs2 = jax.lax.rsqrt(p["bn_rv"] + EPS)
    h = (p["bn_gamma"][None, :, None, None]
         * (h - p["bn_rm"][None, :, None, None]) * rs2[None, :, None, None]
         + p["bn_beta"][None, :, None, None])
    h = jnp.maximum(h, 0.0)
    h = jax.lax.conv_general_dilated(h, p["out_w"], (1, 1), "SAME",
                                     dimension_numbers=dn)
    return jnp.tanh(h + p["out_b"][None, :, None, None])


if __name__ == "__main__":
    DIM_Z, SHARED_DIM, NUM_CLASSES, CH, BOTTOM = 32, 16, 8, 16, 4
    BATCH = 2

    key = jax.random.PRNGKey(0)
    pkey, zkey = jax.random.split(key)
    params = init_params(pkey, dim_z=DIM_Z, shared_dim=SHARED_DIM,
                         num_classes=NUM_CLASSES, ch=CH, bottom=BOTTOM)

    big_gan = SyntheticBigGAN(params, dim_z=DIM_Z, shared_dim=SHARED_DIM,
                              num_classes=NUM_CLASSES, ch=CH, bottom=BOTTOM)
    model = ConditionedBigGAN(big_gan, target_classes=3)
    forward = jax.jit(model.__call__)

    z = jax.random.normal(zkey, (BATCH, DIM_Z), dtype=jnp.float32)

    img = jax.block_until_ready(forward(z))     # classes=None -> scalar-target
    assert img.shape == (BATCH, 3, 2 * BOTTOM, 2 * BOTTOM), img.shape
    assert img.dtype == jnp.float32
    assert bool(jnp.all(jnp.isfinite(img)))
    assert bool(jnp.all(jnp.abs(img) <= 1.0))   # tanh range

    # verify fused bf16 kernel against the unfused f32 reference
    classes_ref = jnp.full((BATCH,), 3, dtype=jnp.int32)
    ref = reference_forward(params, z, classes_ref, ch=CH, bottom=BOTTOM)
    max_err = float(jnp.max(jnp.abs(img - ref)))
    assert max_err < 0.08, f"max abs err vs reference: {max_err}"

    # explicit-classes path
    img2 = jax.block_until_ready(forward(z, jnp.array([1, 5], dtype=jnp.int32)))
    assert img2.shape == img.shape

    print("KERNEL_OK")
</pallas_src>

<mosaic_0001>
module attributes {stable_mosaic.version = 11 : i64} {
  func.func @_biggan_fwd_kernel(%arg0: memref<2x48xf32, #tpu.memory_space<vmem>>, %arg1: memref<48x768xbf16, #tpu.memory_space<vmem>>, %arg2: memref<1x768xf32, #tpu.memory_space<vmem>>, %arg3: memref<256x1024xbf16, #tpu.memory_space<vmem>>, %arg4: memref<1x1024xf32, #tpu.memory_space<vmem>>, %arg5: memref<1x1024xf32, #tpu.memory_space<vmem>>, %arg6: memref<1024x256xbf16, #tpu.memory_space<vmem>>, %arg7: memref<1x256xf32, #tpu.memory_space<vmem>>, %arg8: memref<2x256xf32, #tpu.memory_space<vmem>>) attributes {dimension_semantics = [], scalar_prefetch = 0 : i64, scratch_operands = 0 : i64, tpu.core_type = #tpu.core_type<tc>} {
    %c0 = arith.constant 0 : index
    %c0_0 = arith.constant 0 : index
    %0 = vector.load %arg0[%c0, %c0_0] : memref<2x48xf32, #tpu.memory_space<vmem>>, vector<2x48xf32>
    %1 = arith.truncf %0 : vector<2x48xf32> to vector<2x48xbf16>
    %c0_1 = arith.constant 0 : index
    %c0_2 = arith.constant 0 : index
    %2 = vector.load %arg1[%c0_1, %c0_2] : memref<48x768xbf16, #tpu.memory_space<vmem>>, vector<48x768xbf16>
    %cst = arith.constant dense<0.000000e+00> : vector<2x768xf32>
    %3 = tpu.matmul %1, %2, %cst {dimension_numbers = #tpu.dot_dimension_numbers<[1], [0], [0], [1], [0, 0, 1, 1], [], []>} : vector<2x48xbf16>, vector<48x768xbf16>, vector<2x768xf32> -> vector<2x768xf32>
    %c0_3 = arith.constant 0 : index
    %c0_4 = arith.constant 0 : index
    %4 = vector.load %arg2[%c0_3, %c0_4] : memref<1x768xf32, #tpu.memory_space<vmem>>, vector<1x768xf32>
    %5 = vector.broadcast %4 : vector<1x768xf32> to vector<2x768xf32>
    %6 = arith.addf %3, %5 : vector<2x768xf32>
    %7 = vector.extract_strided_slice %6 {offsets = [0, 0], sizes = [2, 256], strides = [1, 1]} : vector<2x768xf32> to vector<2x256xf32>
    %8 = vector.extract_strided_slice %6 {offsets = [0, 256], sizes = [2, 256], strides = [1, 1]} : vector<2x768xf32> to vector<2x256xf32>
    %9 = vector.extract_strided_slice %6 {offsets = [0, 512], sizes = [2, 256], strides = [1, 1]} : vector<2x768xf32> to vector<2x256xf32>
    %10 = arith.mulf %8, %7 : vector<2x256xf32>
    %11 = arith.addf %10, %9 : vector<2x256xf32>
    %cst_5 = arith.constant 0.000000e+00 : f32
    %12 = vector.broadcast %cst_5 : f32 to vector<2x256xf32>
    %13 = arith.maximumf %11, %12 : vector<2x256xf32>
    %14 = arith.truncf %13 : vector<2x256xf32> to vector<2x256xbf16>
    %c0_6 = arith.constant 0 : index
    %c0_7 = arith.constant 0 : index
    %15 = vector.load %arg3[%c0_6, %c0_7] : memref<256x1024xbf16, #tpu.memory_space<vmem>>, vector<256x1024xbf16>
    %cst_8 = arith.constant dense<0.000000e+00> : vector<2x1024xf32>
    %16 = tpu.matmul %14, %15, %cst_8 {dimension_numbers = #tpu.dot_dimension_numbers<[1], [0], [0], [1], [0, 0, 1, 1], [], []>} : vector<2x256xbf16>, vector<256x1024xbf16>, vector<2x1024xf32> -> vector<2x1024xf32>
    %c0_9 = arith.constant 0 : index
    %c0_10 = arith.constant 0 : index
    %17 = vector.load %arg4[%c0_9, %c0_10] : memref<1x1024xf32, #tpu.memory_space<vmem>>, vector<1x1024xf32>
    %18 = vector.broadcast %17 : vector<1x1024xf32> to vector<2x1024xf32>
    %19 = arith.mulf %16, %18 : vector<2x1024xf32>
    %c0_11 = arith.constant 0 : index
    %c0_12 = arith.constant 0 : index
    %20 = vector.load %arg5[%c0_11, %c0_12] : memref<1x1024xf32, #tpu.memory_space<vmem>>, vector<1x1024xf32>
    %21 = vector.broadcast %20 : vector<1x1024xf32> to vector<2x1024xf32>
    %22 = arith.addf %19, %21 : vector<2x1024xf32>
    %cst_13 = arith.constant 0.000000e+00 : f32
    %23 = vector.broadcast %cst_13 : f32 to vector<2x1024xf32>
    %24 = arith.maximumf %22, %23 : vector<2x1024xf32>
    %25 = arith.truncf %24 : vector<2x1024xf32> to vector<2x1024xbf16>
    %c0_14 = arith.constant 0 : index
    %c0_15 = arith.constant 0 : index
    %26 = vector.load %arg6[%c0_14, %c0_15] : memref<1024x256xbf16, #tpu.memory_space<vmem>>, vector<1024x256xbf16>
    %cst_16 = arith.constant dense<0.000000e+00> : vector<2x256xf32>
    %27 = tpu.matmul %25, %26, %cst_16 {dimension_numbers = #tpu.dot_dimension_numbers<[1], [0], [0], [1], [0, 0, 1, 1], [], []>} : vector<2x1024xbf16>, vector<1024x256xbf16>, vector<2x256xf32> -> vector<2x256xf32>
    %c0_17 = arith.constant 0 : index
    %c0_18 = arith.constant 0 : index
    %28 = vector.load %arg7[%c0_17, %c0_18] : memref<1x256xf32, #tpu.memory_space<vmem>>, vector<1x256xf32>
    %29 = vector.broadcast %28 : vector<1x256xf32> to vector<2x256xf32>
    %30 = arith.addf %27, %29 : vector<2x256xf32>
    %31 = math.tanh %30 : vector<2x256xf32>
    %c0_19 = arith.constant 0 : index
    %c0_20 = arith.constant 0 : index
    %32 = vector.load %arg8[%c0_19, %c0_20] : memref<2x256xf32, #tpu.memory_space<vmem>>, vector<2x256xf32>
    tpu.vector_store %arg8[%c0_19, %c0_20], %31 {strides = array<i32>} : memref<2x256xf32, #tpu.memory_space<vmem>>, vector<2x256xf32>,
    return
  }
}

</mosaic_0001>

<bundles_post_ra>
// kernel: a_call__.1
= control target key start
LH: loop header
LB: loop body
LE: loop exit
PB: predicated region body
PF: predicated region fallthrough
CT: control target
= control target key end

     0   :  { %13 = vsyncpa [#allocation3], 0  ;;  %s4042_s0 = inlined_call_operand.vmem [shape: f32[2,48], index: 0, kind: input, shape index: {}]   ;;  %s4043_s1 = inlined_call_operand.hbm [shape: bf16[48,768], index: 1, kind: input, shape index: {}]   ;;  %s4044_s2 = inlined_call_operand.hbm [shape: f32[1,768], index: 2, kind: input, shape index: {}]   ;;  %s4045_s3 = inlined_call_operand.hbm [shape: bf16[256,1024], index: 3, kind: input, shape index: {}]   ;;  %s4046_s4 = inlined_call_operand.hbm [shape: f32[1,1024], index: 4, kind: input, shape index: {}]   ;;  %s4047_s5 = inlined_call_operand.vmem [shape: f32[1,1024], index: 5, kind: input, shape index: {}]   ;;  %s4048_s6 = inlined_call_operand.hbm [shape: bf16[1024,256], index: 6, kind: input, shape index: {}]   ;;  %s4049_s7 = inlined_call_operand.vmem [shape: f32[1,256], index: 7, kind: input, shape index: {}]   ;;  %s4050_s8 = inlined_call_operand.vmem [shape: f32[2,256], index: 8, kind: output, shape index: {}]  }
   0x1   :  { %14 = vsyncpa [#allocation5], 0  ;;  %s36_s29 = sshll.u32 %s4044_s2, 4  ;;  %s37_s29 = int_to_ptr.hbm [resolvable:$true] %s36_s29 }
   0x2   :  { %15 = vsyncpa [#allocation8], 0  ;;  %s3877_s30 = smov [#allocation4]   ;;  %s60_s12 = sshll.u32 %s4046_s4, 4  ;;  %s61_s12 = int_to_ptr.hbm [resolvable:$true] %s60_s12 }
   0x3   :  { %s38_s9 = sshll.u32 %s3877_s30, 4  ;;  %s3878_s13 = smov [#allocation7]   ;;  %s39_s9 = int_to_ptr.vmem [resolvable:$true] %s38_s9 }
   0x4   :  { %41 = dma.hbm_to_vmem [thread:$0]  %s37_s29, 96, %s39_s9, [#allocation5]  }
   0x5   :  { %s62_s14 = sshll.u32 %s3878_s13, 4  ;;  %s22_s17 = sshll.u32 %s4043_s1, 4  ;;  %s63_s14 = int_to_ptr.vmem [resolvable:$true] %s62_s14  ;;  %s23_s17 = int_to_ptr.hbm [resolvable:$true] %s22_s17 }
   0x6   :  { %65 = dma.hbm_to_vmem [thread:$0]  %s61_s12, 128, %s63_s14, [#allocation8]  }
   0x7   :  { %s3879_s2 = smov [#allocation2]   ;;  %s46_s21 = sshll.u32 %s4045_s3, 4  ;;  %s47_s21 = int_to_ptr.hbm [resolvable:$true] %s46_s21 }
   0x8   :  { %s24_s18 = sshll.u32 %s3879_s2, 4  ;;  %s3880_s22 = smov 384   ;;  %s25_s18 = int_to_ptr.vmem [resolvable:$true] %s24_s18 }
   0x9   :  { %s3881_s4 = smov 24   ;;  %s3882_s23 = smov [#allocation6]  }
   0xa   :  { %30 = dma.hbm_to_vmem [thread:$0]  %s23_s17, 2304, %s25_s18, [#allocation3], %s3880_s22, %s3880_s22, %s3881_s4  }
   0xb   :  { %s48_s24 = sshll.u32 %s3882_s23, 4  ;;  %s3883_s25 = smov 512   ;;  %s49_s24 = int_to_ptr.vmem [resolvable:$true] %s48_s24 }
   0xc   :  { %s3884_s26 = smov 32   ;;  %s72_s28 = sshll.u32 %s4048_s6, 4  ;;  %s73_s28 = int_to_ptr.hbm [resolvable:$true] %s72_s28 }
   0xd   :  { %54 = dma.hbm_to_vmem [thread:$0]  %s47_s21, 16384, %s49_s24, [#allocation5], %s3883_s25, %s3883_s25, %s3884_s26  }
   0xe   :  { %s3885_s29 = smov [#allocation9]   ;;  %s3886_s9 = smov 128  }
   0xf   :  { %s74_s30 = sshll.u32 %s3885_s29, 4  ;;  %s3887_s3 = smov 8   ;;  %s75_s30 = int_to_ptr.vmem [resolvable:$true] %s74_s30 }
  0x10   :  { %80 = dma.hbm_to_vmem [thread:$0]  %s73_s28, 16384, %s75_s30, [#allocation8], %s3886_s9, %s3886_s9, %s3887_s3  }
  0x11   :  { %3871 = dma.done.wait [#allocation3], 2304  }
  0x12   :  { %3872 = vsyncadd [#allocation3], 4294964992 }
  0x13   :  { %3873 = dma.done.wait [#allocation5], 16480  }
  0x14   :  { %3874 = vsyncadd [#allocation5], 4294950816 }
  0x15   :  { %3875 = dma.done.wait [#allocation8], 16512  }
  0x16   :  { %3876 = vsyncadd [#allocation8], 4294950784  ;;  %v2410_v0 = vld [vmem:[#allocation2 + $0x60] sm:$0xf]  ;;  %v3477_v1 = vld [vmem:[#allocation2 + $0x74] sm:$0xf0] }
  0x17   :  { %v3474_v2 = vld [vmem:[#allocation2 + $0x64] sm:$0xf]  ;;  %v2411_v3 = vor.u32 %v3477_v1, %v2410_v0  ;;  %v2412_v4 = vld [vmem:[#allocation2 + $0x78] sm:$0xf0]  ;;  %v2418_v5 = vld [vmem:[#allocation2 + $0x68] sm:$0xf] }
  0x18   :  { %v3478_v6 = vld [vmem:[#allocation2 + $0x7c] sm:$0xf0]  ;;  %v2415_v7 = vor.u32 %v3474_v2, %v2412_v4  ;;  %v3475_v9 = vld [vmem:[#allocation2 + $0x6c] sm:$0xf]  ;;  %v2420_v10 = vld [vmem:[#allocation2 + $0x80] sm:$0xf0] }
  0x19   :  { %v2419_v8 = vor.u32 %v3478_v6, %v2418_v5  ;;  %v2386_v11 = vld [vmem:[#allocation2 + $0x30] sm:$0xf]  ;;  %237 = vmatpush.bf16.msra.mxu0 %v2411_v3  ;;  %v2423_v12 = vor.u32 %v3475_v9, %v2420_v10  ;;  %v3471_v13 = vld [vmem:[#allocation2 + $0x44] sm:$0xf0]  ;;  %v3468_v14 = vld [vmem:[#allocation2 + $0x34] sm:$0xf] }
  0x1a   :  { %v2388_v15 = vld [vmem:[#allocation2 + $0x48] sm:$0xf0]  ;;  %250 = vmatpush.bf16.msra.mxu1 %v2415_v7  ;;  %v2387_v16 = vor.u32 %v3471_v13, %v2386_v11  ;;  %v2394_v18 = vld [vmem:[#allocation2 + $0x38] sm:$0xf]  ;;  %v3472_v19 = vld [vmem:[#allocation2 + $0x4c] sm:$0xf0] }
  0x1b   :  { %263 = vmatpush.bf16.msra.mxu2 %v2419_v8  ;;  %v2391_v17 = vor.u32 %v3468_v14, %v2388_v15  ;;  %v3469_v20 = vld [vmem:[#allocation2 + $0x3c] sm:$0xf]  ;;  %276 = vmatpush.bf16.msra.mxu3 %v2423_v12  ;;  %v2395_v21 = vor.u32 %v3472_v19, %v2394_v18  ;;  %v2396_v22 = vld [vmem:[#allocation2 + $0x50] sm:$0xf0]  ;;  %v2362_v23 = vld [vmem:[#allocation2] sm:$0xf] }
  0x1c   :  { %v3465_v24 = vld [vmem:[#allocation2 + $0x14] sm:$0xf0]  ;;  %v2399_v25 = vor.u32 %v3469_v20, %v2396_v22  ;;  %v3462_v26 = vld [vmem:[#allocation2 + $0x4] sm:$0xf]  ;;  %v2364_v27 = vld [vmem:[#allocation2 + $0x18] sm:$0xf0] }
  0x1d   :  { %v2370_v28 = vld [vmem:[#allocation2 + $0x8] sm:$0xf]  ;;  %238 = vmatpush.bf16.msra.mxu0 %v2387_v16  ;;  %v2363_v29 = vor.u32 %v3465_v24, %v2362_v23  ;;  %v3466_v30 = vld [vmem:[#allocation2 + $0x1c] sm:$0xf0]  ;;  %v3463_v31 = vld [vmem:[#allocation2 + $0xc] sm:$0xf]  ;;  %v2367_v33 = vor.u32 %v3462_v26, %v2364_v27 }
  0x1e   :  { %v2372_v32 = vld [vmem:[#allocation2 + $0x20] sm:$0xf0]  ;;  %251 = vmatpush.bf16.msra.mxu1 %v2391_v17  ;;  %v2371_v34 = vor.u32 %v3466_v30, %v2370_v28  ;;  %v104_v35 = vld [vmem:[%s4042_s0] sm:$0x3]  ;;  %v2426_v36 = vld [vmem:[#allocation2 + $0x70] sm:$0xf] }
  0x1f   :  { %264 = vmatpush.bf16.msra.mxu2 %v2395_v21  ;;  %v3479_v37 = vld [vmem:[#allocation2 + $0x84] sm:$0xf0]  ;;  %277 = vmatpush.bf16.msra.mxu3 %v2399_v25  ;;  %v2375_v38 = vor.u32 %v3463_v31, %v2372_v32  ;;  %v3476_v40 = vld [vmem:[#allocation2 + $0x74] sm:$0xf]  ;;  %v2428_v41 = vld [vmem:[#allocation2 + $0x88] sm:$0xf0]  ;;  %v3951_v42 = vpack.c.bf16 %v104_v35, %v104_v35 }
  0x20   :  { %v2427_v39 = vor.u32 %v3479_v37, %v2426_v36  ;;  %v2431_v43 = vor.u32 %v3476_v40, %v2428_v41  ;;  %v2402_v44 = vld [vmem:[#allocation2 + $0x40] sm:$0xf]  ;;  %v3473_v45 = vld [vmem:[#allocation2 + $0x54] sm:$0xf0]  ;;  %vm228_vm0 = vcmask 392192   ;;  %vm2349_vm1 = vcmask 1041408  }
  0x21   :  { %239 = vmatpush.bf16.msra.mxu0 %v2363_v29  ;;  %v3470_v46 = vld [vmem:[#allocation2 + $0x44] sm:$0xf]  ;;  %v2404_v47 = vld [vmem:[#allocation2 + $0x58] sm:$0xf0]  ;;  %v2378_v48 = vld [vmem:[#allocation2 + $0x10] sm:$0xf]  ;;  %v2403_v52 = vor.u32 %v3473_v45, %v2402_v44 }
  0x22   :  { %252 = vmatpush.bf16.msra.mxu1 %v2367_v33  ;;  %v3467_v49 = vld [vmem:[#allocation2 + $0x24] sm:$0xf0]  ;;  %v2664_v50 = vld [vmem:[#allocation6 + $0x1c0] sm:$0xf]  ;;  %v2407_v57 = vor.u32 %v3470_v46, %v2404_v47  ;;  %v2380_v58 = vld [vmem:[#allocation2 + $0x28] sm:$0xf0] }
  0x23   :  { %265 = vmatpush.bf16.msra.mxu2 %v2371_v34  ;;  %v3540_v51 = vld [vmem:[#allocation6 + $0x1dc] sm:$0xf0]  ;;  %278 = vmatpush.bf16.msra.mxu3 %v2375_v38  ;;  %v3536_v60 = vld [vmem:[#allocation6 + $0x1c4] sm:$0xf]  ;;  %v2379_v5 = vor.u32 %v3467_v49, %v2378_v48 }
  0x24   :  { %v3464_v53 = vld [vmem:[#allocation2 + $0x14] sm:$0xf]  ;;  %v2665_v54 = vor.u32 %v3540_v51, %v2664_v50  ;;  %2432 = vmatmul.msk.bf16.vlgmr.msra.gmra.mxu0 %vm228_vm0, %v3951_v42  ;;  %v2666_v61 = vld [vmem:[#allocation6 + $0x1e0] sm:$0xf0] }
  0x25   :  { %289 = vmatpush.bf16.msrb.mxu0 %v2427_v39  ;;  %v2920_v55 = vld [vmem:[#allocation6 + $0x3c0] sm:$0xf]  ;;  %2433 = vmatmul.msk.bf16.vlgmr.msra.gmra.mxu1 %vm228_vm0, %v3951_v42  ;;  %v3600_v1 = vld [vmem:[#allocation6 + $0x3c4] sm:$0xf]  ;;  %v2383_v8 = vor.u32 %v3464_v53, %v2380_v58  ;;  %v2669_v9 = vor.u32 %v3536_v60, %v2666_v61 }
  0x26   :  { %v3604_v56 = vld [vmem:[#allocation6 + $0x3dc] sm:$0xf0]  ;;  %302 = vmatpush.bf16.msrb.mxu1 %v2431_v43  ;;  %2434 = vmatmul.msk.bf16.vlgmr.msra.gmra.mxu2 %vm228_vm0, %v3951_v42  ;;  %v2922_v2 = vld [vmem:[#allocation6 + $0x3e0] sm:$0xf0] }
  0x27   :  { %v2921_v59 = vor.u32 %v3604_v56, %v2920_v55  ;;  %v2632_v62 = vld [vmem:[#allocation6 + $0x180] sm:$0xf]  ;;  %2435 = vmatmul.msk.bf16.vlgmr.msra.gmra.mxu3 %vm228_vm0, %v3951_v42  ;;  %1086 = vmatpush.bf16.msrb.mxu2 %v2665_v54  ;;  %v2925_v13 = vor.u32 %v3600_v1, %v2922_v2  ;;  %v3528_v14 = vld [vmem:[#allocation6 + $0x184] sm:$0xf] }
  0x28   :  { %v3532_v63 = vld [vmem:[#allocation6 + $0x19c] sm:$0xf0]  ;;  %v2634_v15 = vld [vmem:[#allocation6 + $0x1a0] sm:$0xf0] }
  0x29   :  { %v2888_v0 = vld [vmem:[#allocation6 + $0x380] sm:$0xf]  ;;  %v2633_v3 = vor.u32 %v3532_v63, %v2632_v62  ;;  %290 = vmatpush.bf16.msrb.mxu0 %v2403_v52  ;;  %1099 = vmatpush.bf16.msrb.mxu3 %v2921_v59  ;;  %v3592_v16 = vld [vmem:[#allocation6 + $0x384] sm:$0xf]  ;;  %v2637_v22 = vor.u32 %v3528_v14, %v2634_v15 }
  0x2a   :  { %v3596_v4 = vld [vmem:[#allocation6 + $0x39c] sm:$0xf0]  ;;  %303 = vmatpush.bf16.msrb.mxu1 %v2407_v57  ;;  %v2890_v17 = vld [vmem:[#allocation6 + $0x3a0] sm:$0xf0] }
  0x2b   :  { %v2889_v6 = vor.u32 %v3596_v4, %v2888_v0  ;;  %v2600_v7 = vld [vmem:[#allocation6 + $0x140] sm:$0xf]  ;;  %1087 = vmatpush.bf16.msrb.mxu2 %v2633_v3  ;;  %v2893_v25 = vor.u32 %v3592_v16, %v2890_v17  ;;  %v3520_v26 = vld [vmem:[#allocation6 + $0x144] sm:$0xf] }
  0x2c   :  { %v3524_v10 = vld [vmem:[#allocation6 + $0x15c] sm:$0xf0]  ;;  %v2602_v27 = vld [vmem:[#allocation6 + $0x160] sm:$0xf0] }
  0x2d   :  { %v2856_v11 = vld [vmem:[#allocation6 + $0x340] sm:$0xf]  ;;  %v2601_v18 = vor.u32 %v3524_v10, %v2600_v7  ;;  %291 = vmatpush.bf16.msrb.mxu0 %v2379_v5  ;;  %1100 = vmatpush.bf16.msrb.mxu3 %v2889_v6  ;;  %v3584_v28 = vld [vmem:[#allocation6 + $0x344] sm:$0xf]  ;;  %v2605_v36 = vor.u32 %v3520_v26, %v2602_v27 }
  0x2e   :  { %v3588_v12 = vld [vmem:[#allocation6 + $0x35c] sm:$0xf0]  ;;  %304 = vmatpush.bf16.msrb.mxu1 %v2383_v8  ;;  %v2858_v30 = vld [vmem:[#allocation6 + $0x360] sm:$0xf0]  ;;  %v2672_v8 = vld [vmem:[#allocation6 + $0x1c8] sm:$0xf] }
  0x2f   :  { %v2857_v19 = vor.u32 %v3588_v12, %v2856_v11  ;;  %v2568_v20 = vld [vmem:[#allocation6 + $0x100] sm:$0xf]  ;;  %1088 = vmatpush.bf16.msrb.mxu2 %v2601_v18  ;;  %v2861_v37 = vor.u32 %v3584_v28, %v2858_v30  ;;  %v3512_v38 = vld [vmem:[#allocation6 + $0x104] sm:$0xf]  ;;  %v2928_v11 = vld [vmem:[#allocation6 + $0x3c8] sm:$0xf] }
  0x30   :  { %v3516_v21 = vld [vmem:[#allocation6 + $0x11c] sm:$0xf0]  ;;  %v2570_v39 = vld [vmem:[#allocation6 + $0x120] sm:$0xf0]  ;;  %v3605_v12 = vld [vmem:[#allocation6 + $0x3e4] sm:$0xf0] }
  0x31   :  { %1112 = vmatpush.bf16.msra.mxu0 %v2669_v9  ;;  %v2824_v23 = vld [vmem:[#allocation6 + $0x300] sm:$0xf]  ;;  %v2569_v29 = vor.u32 %v3516_v21, %v2568_v20  ;;  %1101 = vmatpush.bf16.msrb.mxu3 %v2857_v19  ;;  %v3576_v40 = vld [vmem:[#allocation6 + $0x304] sm:$0xf]  ;;  %v2573_v49 = vor.u32 %v3512_v38, %v2570_v39  ;;  %v3541_v9 = vld [vmem:[#allocation6 + $0x1e4] sm:$0xf0]  ;;  %v2929_v21 = vor.u32 %v3605_v12, %v2928_v11 }
  0x32   :  { %v3580_v24 = vld [vmem:[#allocation6 + $0x31c] sm:$0xf0]  ;;  %1125 = vmatpush.bf16.msra.mxu1 %v2925_v13  ;;  %v2826_v43 = vld [vmem:[#allocation6 + $0x320] sm:$0xf0]  ;;  %v2673_v20 = vor.u32 %v3541_v9, %v2672_v8  ;;  %v3537_v28 = vld [vmem:[#allocation6 + $0x1cc] sm:$0xf] }
  0x33   :  { %v2825_v31 = vor.u32 %v3580_v24, %v2824_v23  ;;  %v2536_v32 = vld [vmem:[#allocation6 + $0xc0] sm:$0xf]  ;;  %1089 = vmatpush.bf16.msrb.mxu2 %v2569_v29  ;;  %v2829_v50 = vor.u32 %v3576_v40, %v2826_v43  ;;  %v3504_v51 = vld [vmem:[#allocation6 + $0xc4] sm:$0xf]  ;;  %v2674_v29 = vld [vmem:[#allocation6 + $0x1e8] sm:$0xf0] }
  0x34   :  { %v3508_v33 = vld [vmem:[#allocation6 + $0xdc] sm:$0xf0]  ;;  %2436 = vmatmul.msk.bf16.vlgmr.msrb.gmra.mxu0 %vm228_vm0, %v3951_v42  ;;  %v2538_v52 = vld [vmem:[#allocation6 + $0xe0] sm:$0xf0]  ;;  %v3601_v30 = vld [vmem:[#allocation6 + $0x3cc] sm:$0xf] }
  0x35   :  { %1113 = vmatpush.bf16.msra.mxu0 %v2637_v22  ;;  %v2792_v34 = vld [vmem:[#allocation6 + $0x2c0] sm:$0xf]  ;;  %v2537_v41 = vor.u32 %v3508_v33, %v2536_v32  ;;  %1102 = vmatpush.bf16.msrb.mxu3 %v2825_v31  ;;  %v3568_v53 = vld [vmem:[#allocation6 + $0x2c4] sm:$0xf]  ;;  %v2541_v61 = vor.u32 %v3504_v51, %v2538_v52  ;;  %v2930_v31 = vld [vmem:[#allocation6 + $0x3e8] sm:$0xf0] }
  0x36   :  { %v3572_v35 = vld [vmem:[#allocation6 + $0x2dc] sm:$0xf0]  ;;  %1126 = vmatpush.bf16.msra.mxu1 %v2893_v25  ;;  %v2794_v55 = vld [vmem:[#allocation6 + $0x2e0] sm:$0xf0]  ;;  %v2896_v38 = vld [vmem:[#allocation6 + $0x388] sm:$0xf] }
  0x37   :  { %v2793_v44 = vor.u32 %v3572_v35, %v2792_v34  ;;  %v2504_v45 = vld [vmem:[#allocation6 + $0x80] sm:$0xf]  ;;  %2437 = vmatmul.msk.bf16.vlgmr.msrb.gmra.mxu1 %vm228_vm0, %v3951_v42  ;;  %1090 = vmatpush.bf16.msrb.mxu2 %v2537_v41  ;;  %v3496_v62 = vld [vmem:[#allocation6 + $0x84] sm:$0xf]  ;;  %v2797_v42 = vor.u32 %v3568_v53, %v2794_v55  ;;  %v2677_v34 = vor.u32 %v3537_v28, %v2674_v29  ;;  %v3597_v40 = vld [vmem:[#allocation6 + $0x3a4] sm:$0xf0] }
  0x38   :  { %v3500_v46 = vld [vmem:[#allocation6 + $0x9c] sm:$0xf0]  ;;  %v2506_v63 = vld [vmem:[#allocation6 + $0xa0] sm:$0xf0]  ;;  %v2933_v35 = vor.u32 %v3601_v30, %v2930_v31  ;;  %v3529_v41 = vld [vmem:[#allocation6 + $0x18c] sm:$0xf] }
  0x39   :  { %v2760_v47 = vld [vmem:[#allocation6 + $0x280] sm:$0xf]  ;;  %1114 = vmatpush.bf16.msra.mxu0 %v2605_v36  ;;  %v2505_v54 = vor.u32 %v3500_v46, %v2504_v45  ;;  %1103 = vmatpush.bf16.msrb.mxu3 %v2793_v44  ;;  %v3560_v0 = vld [vmem:[#allocation6 + $0x284] sm:$0xf]  ;;  %v2509_v10 = vor.u32 %v3496_v62, %v2506_v63  ;;  %v2640_v36 = vld [vmem:[#allocation6 + $0x188] sm:$0xf]  ;;  %v2897_v44 = vor.u32 %v3597_v40, %v2896_v38 }
  0x3a   :  { %v3564_v48 = vld [vmem:[#allocation6 + $0x29c] sm:$0xf0]  ;;  %1127 = vmatpush.bf16.msra.mxu1 %v2861_v37  ;;  %v2762_v1 = vld [vmem:[#allocation6 + $0x2a0] sm:$0xf0]  ;;  %v3533_v37 = vld [vmem:[#allocation6 + $0x1a4] sm:$0xf0] }
  0x3b   :  { %v2761_v56 = vor.u32 %v3564_v48, %v2760_v47  ;;  %v2472_v57 = vld [vmem:[#allocation6 + $0x40] sm:$0xf]  ;;  %1091 = vmatpush.bf16.msrb.mxu2 %v2505_v54  ;;  %v2765_v13 = vor.u32 %v3560_v0, %v2762_v1  ;;  %v3488_v14 = vld [vmem:[#allocation6 + $0x44] sm:$0xf]  ;;  %v2641_v39 = vor.u32 %v3533_v37, %v2640_v36  ;;  %v2642_v43 = vld [vmem:[#allocation6 + $0x1a8] sm:$0xf0] }
  0x3c   :  { %v3492_v58 = vld [vmem:[#allocation6 + $0x5c] sm:$0xf0]  ;;  %v2474_v15 = vld [vmem:[#allocation6 + $0x60] sm:$0xf0]  ;;  %v2645_v45 = vor.u32 %v3529_v41, %v2642_v43  ;;  %v3593_v46 = vld [vmem:[#allocation6 + $0x38c] sm:$0xf] }
  0x3d   :  { %v2728_v59 = vld [vmem:[#allocation6 + $0x240] sm:$0xf]  ;;  %1115 = vmatpush.bf16.msra.mxu0 %v2573_v49  ;;  %v2473_v2 = vor.u32 %v3492_v58, %v2472_v57  ;;  %1104 = vmatpush.bf16.msrb.mxu3 %v2761_v56  ;;  %v3552_v17 = vld [vmem:[#allocation6 + $0x244] sm:$0xf]  ;;  %v2477_v22 = vor.u32 %v3488_v14, %v2474_v15  ;;  %v2898_v47 = vld [vmem:[#allocation6 + $0x3a8] sm:$0xf0] }
  0x3e   :  { %v3556_v60 = vld [vmem:[#allocation6 + $0x25c] sm:$0xf0]  ;;  %1128 = vmatpush.bf16.msra.mxu1 %v2829_v50  ;;  %v2730_v18 = vld [vmem:[#allocation6 + $0x260] sm:$0xf0]  ;;  %v2901_v48 = vor.u32 %v3593_v46, %v2898_v47  ;;  %v2608_v49 = vld [vmem:[#allocation6 + $0x148] sm:$0xf] }
  0x3f   :  { %v2729_v3 = vor.u32 %v3556_v60, %v2728_v59  ;;  %v2440_v4 = vld [vmem:[#allocation6] sm:$0xf]  ;;  %1092 = vmatpush.bf16.msrb.mxu2 %v2473_v2  ;;  %v2733_v23 = vor.u32 %v3552_v17, %v2730_v18  ;;  %v3480_v24 = vld [vmem:[#allocation6 + $0x4] sm:$0xf]  ;;  %v3525_v50 = vld [vmem:[#allocation6 + $0x164] sm:$0xf0] }
  0x40   :  { %v3484_v5 = vld [vmem:[#allocation6 + $0x1c] sm:$0xf0]  ;;  %v2442_v25 = vld [vmem:[#allocation6 + $0x20] sm:$0xf0]  ;;  %v2864_v51 = vld [vmem:[#allocation6 + $0x348] sm:$0xf]  ;;  %v2609_v52 = vor.u32 %v3525_v50, %v2608_v49 }
  0x41   :  { %v2696_v6 = vld [vmem:[#allocation6 + $0x200] sm:$0xf]  ;;  %1116 = vmatpush.bf16.msra.mxu0 %v2541_v61  ;;  %v2441_v16 = vor.u32 %v3484_v5, %v2440_v4  ;;  %1105 = vmatpush.bf16.msrb.mxu3 %v2729_v3  ;;  %v3544_v26 = vld [vmem:[#allocation6 + $0x204] sm:$0xf]  ;;  %v2445_v32 = vor.u32 %v3480_v24, %v2442_v25  ;;  %v3589_v53 = vld [vmem:[#allocation6 + $0x364] sm:$0xf0] }
  0x42   :  { %v3548_v7 = vld [vmem:[#allocation6 + $0x21c] sm:$0xf0]  ;;  %1129 = vmatpush.bf16.msra.mxu1 %v2797_v42  ;;  %v2698_v27 = vld [vmem:[#allocation6 + $0x220] sm:$0xf0]  ;;  %v3521_v54 = vld [vmem:[#allocation6 + $0x14c] sm:$0xf]  ;;  %v2865_v56 = vor.u32 %v3589_v53, %v2864_v51 }
  0x43   :  { %v2697_v19 = vor.u32 %v3548_v7, %v2696_v6  ;;  %1093 = vmatpush.bf16.msrb.mxu2 %v2441_v16  ;;  %v2701_v33 = vor.u32 %v3544_v26, %v2698_v27  ;;  %v2610_v55 = vld [vmem:[#allocation6 + $0x168] sm:$0xf0]  ;;  %v2576_v61 = vld [vmem:[#allocation6 + $0x108] sm:$0xf] }
  0x44   :  { %v2613_v57 = vor.u32 %v3521_v54, %v2610_v55  ;;  %v3585_v58 = vld [vmem:[#allocation6 + $0x34c] sm:$0xf]  ;;  %v3517_v62 = vld [vmem:[#allocation6 + $0x124] sm:$0xf0] }
  0x45   :  { %1117 = vmatpush.bf16.msra.mxu0 %v2509_v10  ;;  %1106 = vmatpush.bf16.msrb.mxu3 %v2697_v19  ;;  %v2866_v59 = vld [vmem:[#allocation6 + $0x368] sm:$0xf0]  ;;  %v2577_v42 = vor.u32 %v3517_v62, %v2576_v61  ;;  %v2832_v63 = vld [vmem:[#allocation6 + $0x308] sm:$0xf] }
  0x46   :  { %1130 = vmatpush.bf16.msra.mxu1 %v2765_v13  ;;  %v2869_v60 = vor.u32 %v3585_v58, %v2866_v59  ;;  %v3581_v0 = vld [vmem:[#allocation6 + $0x324] sm:$0xf0]  ;;  %v3513_v1 = vld [vmem:[#allocation6 + $0x10c] sm:$0xf] }
  0x47   :  { %1138 = vmatpush.bf16.msra.mxu2 %v2673_v20  ;;  %v2833_v2 = vor.u32 %v3581_v0, %v2832_v63  ;;  %v2578_v3 = vld [vmem:[#allocation6 + $0x128] sm:$0xf0]  ;;  %v2544_v8 = vld [vmem:[#allocation6 + $0xc8] sm:$0xf] }
  0x48   :  { %v3577_v4 = vld [vmem:[#allocation6 + $0x30c] sm:$0xf]  ;;  %v2581_v6 = vor.u32 %v3513_v1, %v2578_v3  ;;  %v3509_v9 = vld [vmem:[#allocation6 + $0xe4] sm:$0xf0] }
  0x49   :  { %1151 = vmatpush.bf16.msra.mxu3 %v2929_v21  ;;  %1118 = vmatpush.bf16.msra.mxu0 %v2477_v22  ;;  %v2834_v5 = vld [vmem:[#allocation6 + $0x328] sm:$0xf0]  ;;  %v2800_v10 = vld [vmem:[#allocation6 + $0x2c8] sm:$0xf]  ;;  %v2545_v11 = vor.u32 %v3509_v9, %v2544_v8 }
  0x4a   :  { %1131 = vmatpush.bf16.msra.mxu1 %v2733_v23  ;;  %v2837_v7 = vor.u32 %v3577_v4, %v2834_v5  ;;  %v3573_v12 = vld [vmem:[#allocation6 + $0x2e4] sm:$0xf0]  ;;  %v3505_v13 = vld [vmem:[#allocation6 + $0xcc] sm:$0xf] }
  0x4b   :  { %1139 = vmatpush.bf16.msra.mxu2 %v2641_v39  ;;  %v2546_v14 = vld [vmem:[#allocation6 + $0xe8] sm:$0xf0]  ;;  %v2801_v15 = vor.u32 %v3573_v12, %v2800_v10  ;;  %v2512_v20 = vld [vmem:[#allocation6 + $0x88] sm:$0xf] }
  0x4c   :  { %v2549_v16 = vor.u32 %v3505_v13, %v2546_v14  ;;  %v3569_v17 = vld [vmem:[#allocation6 + $0x2cc] sm:$0xf]  ;;  %v3501_v21 = vld [vmem:[#allocation6 + $0xa4] sm:$0xf0] }
  0x4d   :  { %1119 = vmatpush.bf16.msra.mxu0 %v2445_v32  ;;  %1152 = vmatpush.bf16.msra.mxu3 %v2897_v44  ;;  %v2802_v18 = vld [vmem:[#allocation6 + $0x2e8] sm:$0xf0]  ;;  %v2768_v22 = vld [vmem:[#allocation6 + $0x288] sm:$0xf]  ;;  %v2513_v23 = vor.u32 %v3501_v21, %v2512_v20  ;;  %v2936_v20 = vld [vmem:[#allocation6 + $0x3d0] sm:$0xf] }
  0x4e   :  { %1132 = vmatpush.bf16.msra.mxu1 %v2701_v33  ;;  %v2805_v19 = vor.u32 %v3569_v17, %v2802_v18  ;;  %v3565_v24 = vld [vmem:[#allocation6 + $0x2a4] sm:$0xf0]  ;;  %v3497_v25 = vld [vmem:[#allocation6 + $0x8c] sm:$0xf]  ;;  %v2680_v18 = vld [vmem:[#allocation6 + $0x1d0] sm:$0xf] }
  0x4f   :  { %1140 = vmatpush.bf16.msra.mxu2 %v2609_v52  ;;  %v2769_v26 = vor.u32 %v3565_v24, %v2768_v22  ;;  %v2514_v27 = vld [vmem:[#allocation6 + $0xa8] sm:$0xf0]  ;;  %v2480_v32 = vld [vmem:[#allocation6 + $0x48] sm:$0xf]  ;;  %v3606_v22 = vld [vmem:[#allocation6 + $0x3ec] sm:$0xf0] }
  0x50   :  { %v3561_v28 = vld [vmem:[#allocation6 + $0x28c] sm:$0xf]  ;;  %v2517_v29 = vor.u32 %v3497_v25, %v2514_v27  ;;  %v3493_v33 = vld [vmem:[#allocation6 + $0x64] sm:$0xf0]  ;;  %v2682_v24 = vld [vmem:[#allocation6 + $0x1f0] sm:$0xf0] }
  0x51   :  { %1164 = vmatpush.bf16.msrb.mxu0 %v2677_v34  ;;  %1153 = vmatpush.bf16.msra.mxu3 %v2865_v56  ;;  %v2770_v30 = vld [vmem:[#allocation6 + $0x2a8] sm:$0xf0]  ;;  %v2736_v34 = vld [vmem:[#allocation6 + $0x248] sm:$0xf]  ;;  %v2938_v27 = vld [vmem:[#allocation6 + $0x3f0] sm:$0xf0] }
  0x52   :  { %1177 = vmatpush.bf16.msrb.mxu1 %v2933_v35  ;;  %v2773_v31 = vor.u32 %v3561_v28, %v2770_v30  ;;  %v2481_v35 = vor.u32 %v3493_v33, %v2480_v32  ;;  %v3557_v36 = vld [vmem:[#allocation6 + $0x264] sm:$0xf0]  ;;  %v3489_v37 = vld [vmem:[#allocation6 + $0x4c] sm:$0xf]  ;;  %v2648_v32 = vld [vmem:[#allocation6 + $0x190] sm:$0xf] }
  0x53   :  { %1141 = vmatpush.bf16.msra.mxu2 %v2577_v42  ;;  %v2482_v38 = vld [vmem:[#allocation6 + $0x68] sm:$0xf0]  ;;  %v2737_v39 = vor.u32 %v3557_v36, %v2736_v34  ;;  %v3485_v46 = vld [vmem:[#allocation6 + $0x24] sm:$0xf0]  ;;  %v3534_v33 = vld [vmem:[#allocation6 + $0x1ac] sm:$0xf0] }
  0x54   :  { %v2485_v40 = vor.u32 %v3489_v37, %v2482_v38  ;;  %v3553_v41 = vld [vmem:[#allocation6 + $0x24c] sm:$0xf]  ;;  %v2704_v47 = vld [vmem:[#allocation6 + $0x208] sm:$0xf]  ;;  %v2904_v38 = vld [vmem:[#allocation6 + $0x390] sm:$0xf] }
  0x55   :  { %1165 = vmatpush.bf16.msrb.mxu0 %v2645_v45  ;;  %1154 = vmatpush.bf16.msra.mxu3 %v2833_v2  ;;  %v2738_v43 = vld [vmem:[#allocation6 + $0x268] sm:$0xf0]  ;;  %v2448_v45 = vld [vmem:[#allocation6 + $0x8] sm:$0xf] }
  0x56   :  { %1178 = vmatpush.bf16.msrb.mxu1 %v2901_v48  ;;  %v2741_v44 = vor.u32 %v3553_v41, %v2738_v43  ;;  %v2449_v48 = vor.u32 %v3485_v46, %v2448_v45  ;;  %v3549_v49 = vld [vmem:[#allocation6 + $0x224] sm:$0xf0]  ;;  %v3481_v50 = vld [vmem:[#allocation6 + $0xc] sm:$0xf]  ;;  %v2650_v43 = vld [vmem:[#allocation6 + $0x1b0] sm:$0xf0]  ;;  %v2649_v46 = vor.u32 %v3534_v33, %v2648_v32 }
  0x57   :  { %1142 = vmatpush.bf16.msra.mxu2 %v2545_v11  ;;  %v2450_v51 = vld [vmem:[#allocation6 + $0x28] sm:$0xf0]  ;;  %v2705_v52 = vor.u32 %v3549_v49, %v2704_v47  ;;  %v2906_v45 = vld [vmem:[#allocation6 + $0x3b0] sm:$0xf0]  ;;  %v3526_v49 = vld [vmem:[#allocation6 + $0x16c] sm:$0xf0] }
  0x58   :  { %v2453_v53 = vor.u32 %v3481_v50, %v2450_v51  ;;  %v3545_v54 = vld [vmem:[#allocation6 + $0x20c] sm:$0xf]  ;;  %v2488_v32 = vld [vmem:[#allocation6 + $0x50] sm:$0xf] }
  0x59   :  { %1166 = vmatpush.bf16.msrb.mxu0 %v2613_v57  ;;  %1155 = vmatpush.bf16.msra.mxu3 %v2801_v15  ;;  %v2706_v55 = vld [vmem:[#allocation6 + $0x228] sm:$0xf0]  ;;  %v3494_v33 = vld [vmem:[#allocation6 + $0x6c] sm:$0xf0] }
  0x5a   :  { %1179 = vmatpush.bf16.msrb.mxu1 %v2869_v60  ;;  %v2709_v56 = vor.u32 %v3545_v54, %v2706_v55  ;;  %v124_v60 = vld [vmem:[#allocation4] sm:$0x3f]  ;;  %v3522_v54 = vld [vmem:[#allocation6 + $0x154] sm:$0xf] }
  0x5b   :  { %1143 = vmatpush.bf16.msra.mxu2 %v2513_v23  ;;  %v128_v42 = vperm.slane %v124_v60, 2  ;;  %v129_v0 = vperm.slane %v124_v60, 3  ;;  %v126_v1 = vperm.slane %v124_v60, 0  ;;  %v127_v2 = vperm.slane %v124_v60, 1  ;;  %v3538_v23 = vld [vmem:[#allocation6 + $0x1d4] sm:$0xf] }
  0x5c   :  { %v130_v4 = vperm.slane %v124_v60, 4  ;;  %v2685_v36 = vor.u32 %v3538_v23, %v2682_v24  ;;  %v2618_v55 = vld [vmem:[#allocation6 + $0x170] sm:$0xf0]  ;;  %v2776_v23 = vld [vmem:[#allocation6 + $0x290] sm:$0xf] }
  0x5d   :  { %1167 = vmatpush.bf16.msrb.mxu0 %v2581_v6  ;;  %1156 = vmatpush.bf16.msra.mxu3 %v2769_v26  ;;  %v131_v6 = vperm.slane %v124_v60, 5  ;;  %v3602_v26 = vld [vmem:[#allocation6 + $0x3d4] sm:$0xf]  ;;  %v2584_v60 = vld [vmem:[#allocation6 + $0x110] sm:$0xf] }
  0x5e   :  { %1180 = vmatpush.bf16.msrb.mxu1 %v2837_v7  ;;  %v2941_v37 = vor.u32 %v3602_v26, %v2938_v27  ;;  %v3566_v24 = vld [vmem:[#allocation6 + $0x2ac] sm:$0xf0]  ;;  %v2522_v26 = vld [vmem:[#allocation6 + $0xb0] sm:$0xf0] }
  0x5f   :  { %1144 = vmatpush.bf16.msra.mxu2 %v2481_v35  ;;  %v3562_v27 = vld [vmem:[#allocation6 + $0x294] sm:$0xf] }
  0x61   :  { %1168 = vmatpush.bf16.msrb.mxu0 %v2549_v16  ;;  %1157 = vmatpush.bf16.msra.mxu3 %v2737_v39  ;;  %v3598_v39 = vld [vmem:[#allocation6 + $0x3ac] sm:$0xf0] }
  0x62   :  { %1181 = vmatpush.bf16.msrb.mxu1 %v2805_v19  ;;  %v3542_v19 = vld [vmem:[#allocation6 + $0x1ec] sm:$0xf0]  ;;  %v2905_v47 = vor.u32 %v3598_v39, %v2904_v38  ;;  %v3490_v39 = vld [vmem:[#allocation6 + $0x54] sm:$0xf] }
  0x63   :  { %1145 = vmatpush.bf16.msra.mxu2 %v2449_v48  ;;  %v2681_v30 = vor.u32 %v3542_v19, %v2680_v18  ;;  %v2616_v48 = vld [vmem:[#allocation6 + $0x150] sm:$0xf] }
  0x64   :  { %v2520_v19 = vld [vmem:[#allocation6 + $0x90] sm:$0xf] }
  0x65   :  { %1169 = vmatpush.bf16.msrb.mxu0 %v2517_v29  ;;  %1158 = vmatpush.bf16.msra.mxu3 %v2705_v52  ;;  %v2872_v52 = vld [vmem:[#allocation6 + $0x350] sm:$0xf] }
  0x66   :  { %1182 = vmatpush.bf16.msrb.mxu1 %v2773_v31  ;;  %v2937_v31 = vor.u32 %v3606_v22, %v2936_v20  ;;  %v3502_v20 = vld [vmem:[#allocation6 + $0xac] sm:$0xf0] }
  0x67   :  { %v3558_v38 = vld [vmem:[#allocation6 + $0x26c] sm:$0xf0] }
  0x69   :  { %1170 = vmatpush.bf16.msrb.mxu0 %v2485_v40  ;;  %v3530_v40 = vld [vmem:[#allocation6 + $0x194] sm:$0xf] }
  0x6a   :  { %1183 = vmatpush.bf16.msrb.mxu1 %v2741_v44  ;;  %v3594_v44 = vld [vmem:[#allocation6 + $0x394] sm:$0xf]  ;;  %v2653_v50 = vor.u32 %v3530_v40, %v2650_v43 }
  0x6b   :  { %v2909_v51 = vor.u32 %v3594_v44, %v2906_v45  ;;  %v2490_v40 = vld [vmem:[#allocation6 + $0x70] sm:$0xf0]  ;;  %v2456_v44 = vld [vmem:[#allocation6 + $0x10] sm:$0xf]  ;;  %v2489_v45 = vor.u32 %v3494_v33, %v2488_v32 }
  0x6c   :  { %v2746_v43 = vld [vmem:[#allocation6 + $0x270] sm:$0xf0] }
  0x6d   :  { %1171 = vmatpush.bf16.msrb.mxu0 %v2453_v53  ;;  %v3590_v53 = vld [vmem:[#allocation6 + $0x36c] sm:$0xf0] }
  0x6e   :  { %1184 = vmatpush.bf16.msrb.mxu1 %v2709_v56  ;;  %v3586_v56 = vld [vmem:[#allocation6 + $0x354] sm:$0xf] }
  0xa1   :  { %v241_v57 = vpop.f32.mrf.mxu0 }
  0xa2   :  { %v254_v58 = vpop.f32.mrf.mxu1  ;;  %v242_v7 = vadd.f32 %v241_v57, %v126_v1  ;;  %v2874_v57 = vld [vmem:[#allocation6 + $0x370] sm:$0xf0] }
  0xa3   :  { %v255_v9 = vadd.f32 %v254_v58, %v127_v2  ;;  %v2617_v58 = vor.u32 %v3526_v49, %v2616_v48  ;;  %v3514_v1 = vld [vmem:[#allocation6 + $0x114] sm:$0xf]  ;;  %v2712_v48 = vld [vmem:[#allocation6 + $0x210] sm:$0xf] }
  0xa4   :  { %v2586_v2 = vld [vmem:[#allocation6 + $0x130] sm:$0xf0]  ;;  %v3550_v49 = vld [vmem:[#allocation6 + $0x22c] sm:$0xf0] }
  0xa9   :  { %v267_v59 = vpop.f32.mrf.mxu2  ;;  %v243_v62 = vpop.f32.mrf.mxu0 }
  0xaa   :  { %v280_v61 = vpop.f32.mrf.mxu3  ;;  %v256_v63 = vpop.f32.mrf.mxu1  ;;  %v268_v3 = vadd.f32 %v267_v59, %v128_v42  ;;  %v2873_v59 = vor.u32 %v3590_v53, %v2872_v52  ;;  %v2621_v62 = vor.u32 %v3522_v54, %v2618_v55  ;;  %v2877_v42 = vor.u32 %v3586_v56, %v2874_v57  ;;  %v3482_v52 = vld [vmem:[#allocation6 + $0x14] sm:$0xf]  ;;  %v2688_v56 = vld [vmem:[#allocation6 + $0x1d8] sm:$0xf] }
  0xab   :  { %v281_v5 = vadd.f32 %v280_v61, %v129_v0  ;;  %v3518_v61 = vld [vmem:[#allocation6 + $0x12c] sm:$0xf0]  ;;  %v2458_v53 = vld [vmem:[#allocation6 + $0x30] sm:$0xf0]  ;;  %v3543_v57 = vld [vmem:[#allocation6 + $0x1f4] sm:$0xf0] }
  0xac   :  { %v310_v12 = vmul.f32 %v268_v3, %v242_v7  ;;  %v2840_v63 = vld [vmem:[#allocation6 + $0x310] sm:$0xf]  ;;  %v3578_v3 = vld [vmem:[#allocation6 + $0x314] sm:$0xf] }
  0xad   :  { %v311_v15 = vmul.f32 %v281_v5, %v255_v9  ;;  %v3582_v0 = vld [vmem:[#allocation6 + $0x32c] sm:$0xf0]  ;;  %v2585_v5 = vor.u32 %v3518_v61, %v2584_v60  ;;  %v2589_v9 = vor.u32 %v3514_v1, %v2586_v2  ;;  %v3546_v54 = vld [vmem:[#allocation6 + $0x214] sm:$0xf]  ;;  %v3539_v60 = vld [vmem:[#allocation6 + $0x1dc] sm:$0xf]  ;;  %v2461_v1 = vor.u32 %v3482_v52, %v2458_v53 }
  0xae   :  { %v2552_v7 = vld [vmem:[#allocation6 + $0xd0] sm:$0xf]  ;;  %v2714_v55 = vld [vmem:[#allocation6 + $0x230] sm:$0xf0]  ;;  %v3571_v52 = vld [vmem:[#allocation6 + $0x2dc] sm:$0xf] }
  0xaf   :  { %v2717_v2 = vor.u32 %v3546_v54, %v2714_v55  ;;  %v2818_v53 = vld [vmem:[#allocation6 + $0x2f8] sm:$0xf0] }
  0xb1   :  { %v269_v8 = vpop.f32.mrf.mxu2  ;;  %v293_v11 = vpop.f32.mrf.mxu0 }
  0xb2   :  { %v282_v10 = vpop.f32.mrf.mxu3  ;;  %v294_v13 = vadd.f32 %v293_v11, %v130_v4  ;;  %v2842_v4 = vld [vmem:[#allocation6 + $0x330] sm:$0xf0]  ;;  %v3510_v8 = vld [vmem:[#allocation6 + $0xec] sm:$0xf0] }
  0xb3   :  { %v2845_v10 = vor.u32 %v3578_v3, %v2842_v4  ;;  %v2808_v11 = vld [vmem:[#allocation6 + $0x2d0] sm:$0xf]  ;;  %v2689_v3 = vor.u32 %v3543_v57, %v2688_v56  ;;  %v2528_v56 = vld [vmem:[#allocation6 + $0x98] sm:$0xf] }
  0xb4   :  { %v306_v14 = vpop.f32.mrf.mxu1  ;;  %v312_v17 = vadd.f32 %v310_v12, %v294_v13  ;;  %v3574_v12 = vld [vmem:[#allocation6 + $0x2ec] sm:$0xf0]  ;;  %v3506_v13 = vld [vmem:[#allocation6 + $0xd4] sm:$0xf]  ;;  %v3503_v57 = vld [vmem:[#allocation6 + $0xb4] sm:$0xf0] }
  0xb5   :  { %v307_v16 = vadd.f32 %v306_v14, %v131_v6  ;;  %v2841_v6 = vor.u32 %v3582_v0, %v2840_v63  ;;  %v2554_v14 = vld [vmem:[#allocation6 + $0xf0] sm:$0xf0]  ;;  %v2809_v18 = vor.u32 %v3574_v12, %v2808_v11  ;;  %v3603_v63 = vld [vmem:[#allocation6 + $0x3dc] sm:$0xf] }
  0xb6   :  { %v314_v25 = vmax.f32 %v312_v17, 0.0  ;;  %v2553_v17 = vor.u32 %v3510_v8, %v2552_v7  ;;  %v2946_v0 = vld [vmem:[#allocation6 + $0x3f8] sm:$0xf0] }
  0xb7   :  { %v313_v21 = vadd.f32 %v311_v15, %v307_v16  ;;  %v3570_v15 = vld [vmem:[#allocation6 + $0x2d4] sm:$0xf]  ;;  %v2949_v8 = vor.u32 %v3603_v63, %v2946_v0  ;;  %v3531_v11 = vld [vmem:[#allocation6 + $0x19c] sm:$0xf] }
  0xb8   :  { %v3965_v29 = vpack.c.bf16 %v314_v25, %v314_v25  ;;  %v2810_v16 = vld [vmem:[#allocation6 + $0x2f0] sm:$0xf0]  ;;  %v2658_v12 = vld [vmem:[#allocation6 + $0x1b8] sm:$0xf0] }
  0xb9   :  { %v315_v28 = vmax.f32 %v313_v21, 0.0  ;;  %v295_v35 = vpop.f32.mrf.mxu0  ;;  %v2557_v21 = vor.u32 %v3506_v13, %v2554_v14  ;;  %v2813_v22 = vor.u32 %v3570_v15, %v2810_v16  ;;  %v3498_v25 = vld [vmem:[#allocation6 + $0x94] sm:$0xf]  ;;  %v3595_v13 = vld [vmem:[#allocation6 + $0x39c] sm:$0xf] }
  0xba   :  { %1094 = vmatmul.bf16.vlgmr.msrb.gmra.mxu2 %v3965_v29  ;;  %1120 = vmatmul.bf16.vlgmr.msra.gmra.mxu0 %v3965_v29  ;;  %v2525_v35 = vor.u32 %v3498_v25, %v2522_v26  ;;  %v2914_v14 = vld [vmem:[#allocation6 + $0x3b8] sm:$0xf0] }
  0xbb   :  { %v3967_v34 = vpack.c.bf16 %v315_v28, %v315_v28  ;;  %1190 = vmatpush.bf16.msrb.mxu2 %v2681_v30  ;;  %1216 = vmatpush.bf16.msra.mxu0 %v2685_v36  ;;  %v2778_v28 = vld [vmem:[#allocation6 + $0x2b0] sm:$0xf0]  ;;  %v2521_v30 = vor.u32 %v3502_v20, %v2520_v19  ;;  %v2661_v19 = vor.u32 %v3531_v11, %v2658_v12  ;;  %v3587_v25 = vld [vmem:[#allocation6 + $0x35c] sm:$0xf] }
  0xbc   :  { %v308_v41 = vpop.f32.mrf.mxu1  ;;  %v2781_v36 = vor.u32 %v3562_v27, %v2778_v28  ;;  %v2917_v20 = vor.u32 %v3595_v13, %v2914_v14  ;;  %v2882_v26 = vld [vmem:[#allocation6 + $0x378] sm:$0xf0] }
  0xbd   :  { %1107 = vmatmul.bf16.vlgmr.msrb.gmra.mxu3 %v3967_v34  ;;  %1133 = vmatmul.bf16.vlgmr.msra.gmra.mxu1 %v3967_v34  ;;  %v3554_v41 = vld [vmem:[#allocation6 + $0x254] sm:$0xf]  ;;  %v2885_v33 = vor.u32 %v3587_v25, %v2882_v26  ;;  %v3563_v63 = vld [vmem:[#allocation6 + $0x29c] sm:$0xf]  ;;  %v3072_v25 = vld [vmem:[#allocation9 + $0xf0] sm:$0xf] }
  0xbe   :  { %1203 = vmatpush.bf16.msrb.mxu3 %v2937_v31  ;;  %1229 = vmatpush.bf16.msra.mxu1 %v2941_v37  ;;  %v2777_v31 = vor.u32 %v3566_v24, %v2776_v23  ;;  %v2744_v37 = vld [vmem:[#allocation6 + $0x250] sm:$0xf]  ;;  %v3523_v23 = vld [vmem:[#allocation6 + $0x15c] sm:$0xf]  ;;  %v3639_v26 = vld [vmem:[#allocation9 + $0xf4] sm:$0xf0] }
  0xbf   :  { %1191 = vmatpush.bf16.msrb.mxu2 %v2649_v46  ;;  %1217 = vmatpush.bf16.msra.mxu0 %v2653_v50  ;;  %v2745_v46 = vor.u32 %v3558_v38, %v2744_v37  ;;  %v2493_v50 = vor.u32 %v3490_v39, %v2490_v40  ;;  %v2626_v24 = vld [vmem:[#allocation6 + $0x178] sm:$0xf0] }
  0xc0   :  { %v2629_v32 = vor.u32 %v3523_v23, %v2626_v24  ;;  %v3515_v37 = vld [vmem:[#allocation6 + $0x11c] sm:$0xf] }
  0xc1   :  { %v2594_v38 = vld [vmem:[#allocation6 + $0x138] sm:$0xf0] }
  0xc2   :  { %1204 = vmatpush.bf16.msrb.mxu3 %v2905_v47  ;;  %1230 = vmatpush.bf16.msra.mxu1 %v2909_v51  ;;  %v3486_v47 = vld [vmem:[#allocation6 + $0x2c] sm:$0xf0]  ;;  %v2749_v51 = vor.u32 %v3554_v41, %v2746_v43  ;;  %v3579_v39 = vld [vmem:[#allocation6 + $0x31c] sm:$0xf] }
  0xc3   :  { %1192 = vmatpush.bf16.msrb.mxu2 %v2617_v58  ;;  %1218 = vmatpush.bf16.msra.mxu0 %v2621_v62  ;;  %v2944_v58 = vld [vmem:[#allocation6 + $0x3d8] sm:$0xf]  ;;  %v2457_v61 = vor.u32 %v3486_v47, %v2456_v44  ;;  %v2713_v62 = vor.u32 %v3550_v49, %v2712_v48  ;;  %v2850_v40 = vld [vmem:[#allocation6 + $0x338] sm:$0xf0] }
  0xc4   :  { %v2560_v44 = vld [vmem:[#allocation6 + $0xd8] sm:$0xf]  ;;  %v2853_v47 = vor.u32 %v3579_v39, %v2850_v40  ;;  %v2786_v0 = vld [vmem:[#allocation6 + $0x2b8] sm:$0xf0]  ;;  %v3671_v39 = vld [vmem:[#allocation9 + $0x1f4] sm:$0xf0] }
  0xc5   :  { %v2816_v48 = vld [vmem:[#allocation6 + $0x2d8] sm:$0xf]  ;;  %v3555_v11 = vld [vmem:[#allocation6 + $0x25c] sm:$0xf]  ;;  %v3637_v40 = vld [vmem:[#allocation9 + $0xe4] sm:$0xf0] }
  0xc6   :  { %1205 = vmatpush.bf16.msrb.mxu3 %v2873_v59  ;;  %1231 = vmatpush.bf16.msra.mxu1 %v2877_v42  ;;  %v3607_v59 = vld [vmem:[#allocation6 + $0x3f4] sm:$0xf0]  ;;  %v2690_v42 = vld [vmem:[#allocation6 + $0x1f8] sm:$0xf0] }
  0xc7   :  { %1193 = vmatpush.bf16.msrb.mxu2 %v2585_v5  ;;  %1219 = vmatpush.bf16.msra.mxu0 %v2589_v9  ;;  %v2945_v4 = vor.u32 %v3607_v59, %v2944_v58  ;;  %v2656_v5 = vld [vmem:[#allocation6 + $0x198] sm:$0xf]  ;;  %v2693_v7 = vor.u32 %v3539_v60, %v2690_v42  ;;  %v2821_v59 = vor.u32 %v3571_v52, %v2818_v53  ;;  %v2530_v42 = vld [vmem:[#allocation6 + $0xb8] sm:$0xf0]  ;;  %v3619_v52 = vld [vmem:[#allocation9 + $0x54] sm:$0xf0] }
  0xc8   :  { %v2912_v9 = vld [vmem:[#allocation6 + $0x398] sm:$0xf]  ;;  %v2754_v12 = vld [vmem:[#allocation6 + $0x278] sm:$0xf0] }
  0xc9   :  { %v3575_v49 = vld [vmem:[#allocation6 + $0x2f4] sm:$0xf0]  ;;  %v3547_v23 = vld [vmem:[#allocation6 + $0x21c] sm:$0xf] }
  0xca   :  { %1206 = vmatpush.bf16.msrb.mxu3 %v2841_v6  ;;  %1232 = vmatpush.bf16.msra.mxu1 %v2845_v10  ;;  %v3535_v6 = vld [vmem:[#allocation6 + $0x1b4] sm:$0xf0]  ;;  %v2817_v55 = vor.u32 %v3575_v49, %v2816_v48  ;;  %v2722_v24 = vld [vmem:[#allocation6 + $0x238] sm:$0xf0]  ;;  %v3192_v49 = vld [vmem:[#allocation9 + $0x1e0] sm:$0xf] }
  0xcb   :  { %1146 = vmatmul.bf16.vlgmr.msra.gmra.mxu2 %v3965_v29  ;;  %1172 = vmatmul.bf16.vlgmr.msrb.gmra.mxu0 %v3965_v29  ;;  %v3599_v10 = vld [vmem:[#allocation6 + $0x3b4] sm:$0xf0]  ;;  %v2657_v15 = vor.u32 %v3535_v6, %v2656_v5  ;;  %v2789_v6 = vor.u32 %v3563_v63, %v2786_v0  ;;  %v3617_v63 = vld [vmem:[#allocation9 + $0x44] sm:$0xf0]  ;;  %v3128_v0 = vld [vmem:[#allocation9 + $0x160] sm:$0xf] }
  0xcc   :  { %1194 = vmatpush.bf16.msrb.mxu2 %v2553_v17  ;;  %1220 = vmatpush.bf16.msra.mxu0 %v2557_v21  ;;  %v2913_v16 = vor.u32 %v3599_v10, %v2912_v9  ;;  %v2624_v17 = vld [vmem:[#allocation6 + $0x158] sm:$0xf]  ;;  %v3491_v9 = vld [vmem:[#allocation6 + $0x5c] sm:$0xf] }
  0xcd   :  { %1159 = vmatmul.bf16.vlgmr.msra.gmra.mxu3 %v3967_v34  ;;  %1185 = vmatmul.bf16.vlgmr.msrb.gmra.mxu1 %v3967_v34  ;;  %v2880_v21 = vld [vmem:[#allocation6 + $0x358] sm:$0xf]  ;;  %v2498_v10 = vld [vmem:[#allocation6 + $0x78] sm:$0xf0] }
  0xce   :  { %1207 = vmatpush.bf16.msrb.mxu3 %v2809_v18  ;;  %1233 = vmatpush.bf16.msra.mxu1 %v2813_v22  ;;  %v3527_v18 = vld [vmem:[#allocation6 + $0x174] sm:$0xf0] }
  0xcf   :  { %v3591_v22 = vld [vmem:[#allocation6 + $0x374] sm:$0xf0]  ;;  %v2625_v27 = vor.u32 %v3527_v18, %v2624_v17  ;;  %v2501_v18 = vor.u32 %v3491_v9, %v2498_v10  ;;  %v3615_v9 = vld [vmem:[#allocation9 + $0x34] sm:$0xf0] }
  0xd0   :  { %1195 = vmatpush.bf16.msrb.mxu2 %v2521_v30  ;;  %1221 = vmatpush.bf16.msra.mxu0 %v2525_v35  ;;  %v2881_v28 = vor.u32 %v3591_v22, %v2880_v21  ;;  %v2592_v30 = vld [vmem:[#allocation6 + $0x118] sm:$0xf]  ;;  %v3483_v21 = vld [vmem:[#allocation6 + $0x1c] sm:$0xf] }
  0xd1   :  { %v2848_v35 = vld [vmem:[#allocation6 + $0x318] sm:$0xf]  ;;  %v2466_v22 = vld [vmem:[#allocation6 + $0x38] sm:$0xf0] }
  0xd2   :  { %1208 = vmatpush.bf16.msrb.mxu3 %v2777_v31  ;;  %1234 = vmatpush.bf16.msra.mxu1 %v2781_v36  ;;  %v3519_v31 = vld [vmem:[#allocation6 + $0x134] sm:$0xf0] }
  0xd3   :  { %v3583_v36 = vld [vmem:[#allocation6 + $0x334] sm:$0xf0]  ;;  %v2593_v41 = vor.u32 %v3519_v31, %v2592_v30 }
  0xd4   :  { %1196 = vmatpush.bf16.msrb.mxu2 %v2489_v45  ;;  %1222 = vmatpush.bf16.msra.mxu0 %v2493_v50  ;;  %v2849_v43 = vor.u32 %v3583_v36, %v2848_v35  ;;  %v3511_v45 = vld [vmem:[#allocation6 + $0xf4] sm:$0xf0]  ;;  %v3507_v50 = vld [vmem:[#allocation6 + $0xdc] sm:$0xf]  ;;  %v3073_v35 = vor.u32 %v3639_v26, %v3072_v25  ;;  %v3064_v36 = vld [vmem:[#allocation9 + $0xe0] sm:$0xf] }
  0xd5   :  { %v2561_v54 = vor.u32 %v3511_v45, %v2560_v44  ;;  %v2784_v60 = vld [vmem:[#allocation6 + $0x298] sm:$0xf]  ;;  %v3611_v25 = vld [vmem:[#allocation9 + $0x14] sm:$0xf0] }
  0xd6   :  { %1209 = vmatpush.bf16.msrb.mxu3 %v2745_v46  ;;  %1235 = vmatpush.bf16.msra.mxu1 %v2749_v51  ;;  %v2597_v46 = vor.u32 %v3515_v37, %v2594_v38  ;;  %v2562_v51 = vld [vmem:[#allocation6 + $0xf8] sm:$0xf0]  ;;  %v2720_v17 = vld [vmem:[#allocation6 + $0x218] sm:$0xf] }
  0xd7   :  { %v2565_v58 = vor.u32 %v3507_v50, %v2562_v51  ;;  %v3200_v38 = vld [vmem:[#allocation9 + $0x1f0] sm:$0xf]  ;;  %v3669_v50 = vld [vmem:[#allocation9 + $0x1e4] sm:$0xf0] }
  0xd8   :  { %1197 = vmatpush.bf16.msrb.mxu2 %v2457_v61  ;;  %1223 = vmatpush.bf16.msra.mxu0 %v2461_v1  ;;  %v3567_v61 = vld [vmem:[#allocation6 + $0x2b4] sm:$0xf0]  ;;  %v2529_v1 = vor.u32 %v3503_v57, %v2528_v56  ;;  %v3201_v45 = vor.u32 %v3671_v39, %v3200_v38  ;;  %v3633_v56 = vld [vmem:[#allocation9 + $0xc4] sm:$0xf0]  ;;  %v3193_v57 = vor.u32 %v3669_v50, %v3192_v49  ;;  %v3699_v50 = vld [vmem:[#allocation9 + $0x2d4] sm:$0xf0] }
  0xd9   :  { %v3056_v44 = vld [vmem:[#allocation9 + $0xd0] sm:$0xf] }
  0xda   :  { %1210 = vmatpush.bf16.msrb.mxu3 %v2713_v62  ;;  %1236 = vmatpush.bf16.msra.mxu1 %v2717_v2  ;;  %v3499_v62 = vld [vmem:[#allocation6 + $0x9c] sm:$0xf]  ;;  %v2785_v2 = vor.u32 %v3567_v61, %v2784_v60  ;;  %v2992_v51 = vld [vmem:[#allocation9 + $0x50] sm:$0xf]  ;;  %v2984_v61 = vld [vmem:[#allocation9 + $0x40] sm:$0xf] }
  0xdb   :  { %1198 = vmatmul.bf16.vlgmr.msrb.gmra.mxu2 %v3965_v29  ;;  %1224 = vmatmul.bf16.vlgmr.msra.gmra.mxu0 %v3965_v29  ;;  %v2533_v5 = vor.u32 %v3499_v62, %v2530_v42  ;;  %v3136_v53 = vld [vmem:[#allocation9 + $0x170] sm:$0xf]  ;;  %v2993_v60 = vor.u32 %v3619_v52, %v2992_v51  ;;  %v3667_v42 = vld [vmem:[#allocation9 + $0x1d4] sm:$0xf0] }
  0xdc   :  { %1242 = vmatpush.bf16.msra.mxu2 %v2689_v3  ;;  %1268 = vmatpush.bf16.msrb.mxu0 %v2693_v7  ;;  %v2496_v3 = vld [vmem:[#allocation6 + $0x58] sm:$0xf]  ;;  %v3683_v52 = vld [vmem:[#allocation9 + $0x254] sm:$0xf0] }
  0xdd   :  { %1211 = vmatmul.bf16.vlgmr.msrb.gmra.mxu3 %v3967_v34  ;;  %1237 = vmatmul.bf16.vlgmr.msra.gmra.mxu1 %v3967_v34  ;;  %v2752_v7 = vld [vmem:[#allocation6 + $0x258] sm:$0xf] }
  0xde   :  { %1255 = vmatpush.bf16.msra.mxu3 %v2945_v4  ;;  %1281 = vmatpush.bf16.msrb.mxu1 %v2949_v8  ;;  %v3495_v4 = vld [vmem:[#allocation6 + $0x74] sm:$0xf0] }
  0xdf   :  { %v3559_v8 = vld [vmem:[#allocation6 + $0x274] sm:$0xf0]  ;;  %v2497_v13 = vor.u32 %v3495_v4, %v2496_v3 }
  0xe0   :  { %1243 = vmatpush.bf16.msra.mxu2 %v2657_v15  ;;  %1269 = vmatpush.bf16.msrb.mxu0 %v2661_v19  ;;  %v2753_v14 = vor.u32 %v3559_v8, %v2752_v7  ;;  %v2464_v15 = vld [vmem:[#allocation6 + $0x18] sm:$0xf]  ;;  %v2757_v19 = vor.u32 %v3555_v11, %v2754_v12  ;;  %v3176_v7 = vld [vmem:[#allocation9 + $0x1c0] sm:$0xf]  ;;  %v3665_v8 = vld [vmem:[#allocation9 + $0x1c4] sm:$0xf0] }
  0xe1   :  { %v3184_v62 = vld [vmem:[#allocation9 + $0x1d0] sm:$0xf]  ;;  %v3651_v11 = vld [vmem:[#allocation9 + $0x154] sm:$0xf0] }
  0xe2   :  { %1256 = vmatpush.bf16.msra.mxu3 %v2913_v16  ;;  %1282 = vmatpush.bf16.msrb.mxu1 %v2917_v20  ;;  %v3487_v16 = vld [vmem:[#allocation6 + $0x34] sm:$0xf0]  ;;  %v3185_v3 = vor.u32 %v3667_v42, %v3184_v62  ;;  %v3240_v42 = vld [vmem:[#allocation9 + $0x240] sm:$0xf] }
  0xe3   :  { %v3551_v20 = vld [vmem:[#allocation6 + $0x234] sm:$0xf0]  ;;  %v2465_v30 = vor.u32 %v3487_v16, %v2464_v15  ;;  %v3032_v15 = vld [vmem:[#allocation9 + $0xa0] sm:$0xf] }
  0xe4   :  { %1244 = vmatpush.bf16.msra.mxu2 %v2625_v27  ;;  %1270 = vmatpush.bf16.msrb.mxu0 %v2629_v32  ;;  %v3008_v27 = vld [vmem:[#allocation9 + $0x70] sm:$0xf]  ;;  %v2721_v31 = vor.u32 %v3551_v20, %v2720_v17  ;;  %v2469_v32 = vor.u32 %v3483_v21, %v2466_v22  ;;  %v3629_v17 = vld [vmem:[#allocation9 + $0xa4] sm:$0xf0] }
  0xe5   :  { %v3120_v10 = vld [vmem:[#allocation9 + $0x150] sm:$0xf]  ;;  %v3033_v20 = vor.u32 %v3629_v17, %v3032_v15  ;;  %v3693_v15 = vld [vmem:[#allocation9 + $0x2a4] sm:$0xf0]  ;;  %v3096_v17 = vld [vmem:[#allocation9 + $0x120] sm:$0xf] }
  0xe6   :  { %1257 = vmatpush.bf16.msra.mxu3 %v2881_v28  ;;  %1283 = vmatpush.bf16.msrb.mxu1 %v2885_v33  ;;  %v3623_v28 = vld [vmem:[#allocation9 + $0x74] sm:$0xf0]  ;;  %v2725_v33 = vor.u32 %v3547_v23, %v2722_v24  ;;  %v3121_v12 = vor.u32 %v3651_v11, %v3120_v10  ;;  %v3024_v21 = vld [vmem:[#allocation9 + $0x90] sm:$0xf] }
  0xe7   :  { %v3009_v37 = vor.u32 %v3623_v28, %v3008_v27  ;;  %v3627_v23 = vld [vmem:[#allocation9 + $0x94] sm:$0xf0]  ;;  %v2960_v24 = vld [vmem:[#allocation9 + $0x10] sm:$0xf]  ;;  %v3016_v27 = vld [vmem:[#allocation9 + $0x80] sm:$0xf] }
  0xe8   :  { %1245 = vmatpush.bf16.msra.mxu2 %v2593_v41  ;;  %1271 = vmatpush.bf16.msrb.mxu0 %v2597_v46  ;;  %v3000_v41 = vld [vmem:[#allocation9 + $0x60] sm:$0xf]  ;;  %v3065_v46 = vor.u32 %v3637_v40, %v3064_v36  ;;  %v3025_v26 = vor.u32 %v3627_v23, %v3024_v21  ;;  %v3625_v28 = vld [vmem:[#allocation9 + $0x84] sm:$0xf0]  ;;  %v3264_v36 = vld [vmem:[#allocation9 + $0x270] sm:$0xf] }
  0xe9   :  { %v3017_v38 = vor.u32 %v3625_v28, %v3016_v27  ;;  %v3312_v49 = vld [vmem:[#allocation9 + $0x2d0] sm:$0xf]  ;;  %v3677_v21 = vld [vmem:[#allocation9 + $0x224] sm:$0xf0]  ;;  %v3691_v27 = vld [vmem:[#allocation9 + $0x294] sm:$0xf0] }
  0xea   :  { %1258 = vmatpush.bf16.msra.mxu3 %v2849_v43  ;;  %1284 = vmatpush.bf16.msrb.mxu1 %v2853_v47  ;;  %v3621_v43 = vld [vmem:[#allocation9 + $0x64] sm:$0xf0]  ;;  %v3635_v47 = vld [vmem:[#allocation9 + $0xd4] sm:$0xf0]  ;;  %v3248_v51 = vld [vmem:[#allocation9 + $0x250] sm:$0xf] }
  0xeb   :  { %v3001_v48 = vor.u32 %v3621_v43, %v3000_v41  ;;  %v3320_v41 = vld [vmem:[#allocation9 + $0x2e0] sm:$0xf] }
  0xec   :  { %1246 = vmatpush.bf16.msra.mxu2 %v2561_v54  ;;  %1272 = vmatpush.bf16.msrb.mxu0 %v2565_v58  ;;  %v3655_v54 = vld [vmem:[#allocation9 + $0x174] sm:$0xf0] }
  0xed   :  { %v3137_v58 = vor.u32 %v3655_v54, %v3136_v53  ;;  %v3313_v53 = vor.u32 %v3699_v50, %v3312_v49  ;;  %v3249_v54 = vor.u32 %v3683_v52, %v3248_v51  ;;  %v3208_v50 = vld [vmem:[#allocation9 + $0x200] sm:$0xf]  ;;  %v3673_v52 = vld [vmem:[#allocation9 + $0x204] sm:$0xf0] }
  0xee   :  { %1259 = vmatpush.bf16.msra.mxu3 %v2817_v55  ;;  %1285 = vmatpush.bf16.msrb.mxu1 %v2821_v59  ;;  %v3048_v55 = vld [vmem:[#allocation9 + $0xc0] sm:$0xf]  ;;  %v3057_v59 = vor.u32 %v3635_v47, %v3056_v44  ;;  %v3701_v44 = vld [vmem:[#allocation9 + $0x2e4] sm:$0xf0] }
  0xef   :  { %v3049_v4 = vor.u32 %v3633_v56, %v3048_v55  ;;  %v3321_v47 = vor.u32 %v3701_v44, %v3320_v41  ;;  %v3168_v55 = vld [vmem:[#allocation9 + $0x1b0] sm:$0xf]  ;;  %v3663_v56 = vld [vmem:[#allocation9 + $0x1b4] sm:$0xf0]  ;;  %v3689_v41 = vld [vmem:[#allocation9 + $0x284] sm:$0xf0] }
  0xf0   :  { %1247 = vmatpush.bf16.msra.mxu2 %v2529_v1  ;;  %1273 = vmatpush.bf16.msrb.mxu0 %v2533_v5  ;;  %v3653_v1 = vld [vmem:[#allocation9 + $0x164] sm:$0xf0]  ;;  %v2985_v5 = vor.u32 %v3617_v63, %v2984_v61  ;;  %v3448_v44 = vld [vmem:[#allocation9 + $0x3e0] sm:$0xf] }
  0xf1   :  { %v3649_v61 = vld [vmem:[#allocation9 + $0x144] sm:$0xf0] }
  0xf2   :  { %1260 = vmatpush.bf16.msra.mxu3 %v2785_v2  ;;  %1286 = vmatpush.bf16.msrb.mxu1 %v2789_v6  ;;  %v3040_v2 = vld [vmem:[#allocation9 + $0xb0] sm:$0xf]  ;;  %v3681_v63 = vld [vmem:[#allocation9 + $0x244] sm:$0xf0] }
  0xf3   :  { %v2976_v6 = vld [vmem:[#allocation9 + $0x30] sm:$0xf] }
  0xf4   :  { %1248 = vmatpush.bf16.msra.mxu2 %v2497_v13  ;;  %1274 = vmatpush.bf16.msrb.mxu0 %v2501_v18  ;;  %v3177_v13 = vor.u32 %v3665_v8, %v3176_v7  ;;  %v2977_v16 = vor.u32 %v3615_v9, %v2976_v6  ;;  %v2968_v18 = vld [vmem:[#allocation9 + $0x20] sm:$0xf]  ;;  %v3647_v6 = vld [vmem:[#allocation9 + $0x134] sm:$0xf0]  ;;  %v3232_v8 = vld [vmem:[#allocation9 + $0x230] sm:$0xf] }
  0xf5   :  { %v3679_v9 = vld [vmem:[#allocation9 + $0x234] sm:$0xf0] }
  0xf6   :  { %1261 = vmatpush.bf16.msra.mxu3 %v2753_v14  ;;  %1287 = vmatpush.bf16.msrb.mxu1 %v2757_v19  ;;  %v3613_v19 = vld [vmem:[#allocation9 + $0x24] sm:$0xf0]  ;;  %v3233_v11 = vor.u32 %v3679_v9, %v3232_v8 }
  0xf7   :  { %v2969_v22 = vor.u32 %v3613_v19, %v2968_v18  ;;  %v3645_v18 = vld [vmem:[#allocation9 + $0x124] sm:$0xf0] }
  0xf8   :  { %1249 = vmatpush.bf16.msra.mxu2 %v2465_v30  ;;  %1275 = vmatpush.bf16.msrb.mxu0 %v2469_v32  ;;  %v2961_v30 = vor.u32 %v3611_v25, %v2960_v24  ;;  %v2952_v32 = vld [vmem:[#allocation9] sm:$0xf]  ;;  %v3097_v19 = vor.u32 %v3645_v18, %v3096_v17  ;;  %v3657_v25 = vld [vmem:[#allocation9 + $0x184] sm:$0xf0] }
  0xf9   :  { %v3144_v24 = vld [vmem:[#allocation9 + $0x180] sm:$0xf] }
  0xfa   :  { %1262 = vmatpush.bf16.msra.mxu3 %v2721_v31  ;;  %1288 = vmatpush.bf16.msrb.mxu1 %v2725_v33  ;;  %v3328_v31 = vld [vmem:[#allocation9 + $0x2f0] sm:$0xf]  ;;  %v3609_v33 = vld [vmem:[#allocation9 + $0x4] sm:$0xf0]  ;;  %v3145_v28 = vor.u32 %v3657_v25, %v3144_v24  ;;  %v3638_v24 = vld [vmem:[#allocation9 + $0xf4] sm:$0xf] }
  0xfb   :  { %1250 = vmatmul.bf16.vlgmr.msra.gmra.mxu2 %v3965_v29  ;;  %1276 = vmatmul.bf16.vlgmr.msrb.gmra.mxu0 %v3965_v29  ;;  %v3129_v29 = vor.u32 %v3653_v1, %v3128_v0  ;;  %v2953_v39 = vor.u32 %v3609_v33, %v2952_v32  ;;  %v3241_v1 = vor.u32 %v3681_v63, %v3240_v42  ;;  %v3088_v32 = vld [vmem:[#allocation9 + $0x110] sm:$0xf]  ;;  %v3643_v33 = vld [vmem:[#allocation9 + $0x114] sm:$0xf0]  ;;  %v3432_v42 = vld [vmem:[#allocation9 + $0x3c0] sm:$0xf] }
  0xfc   :  { %2136 = vmatpush.bf16.msrb.mxu2 %v3009_v37  ;;  %2162 = vmatpush.bf16.msra.mxu0 %v3137_v58  ;;  %v3687_v37 = vld [vmem:[#allocation9 + $0x274] sm:$0xf0]  ;;  %v3697_v58 = vld [vmem:[#allocation9 + $0x2c4] sm:$0xf0]  ;;  %v3074_v25 = vld [vmem:[#allocation9 + $0xf8] sm:$0xf0] }
  0xfd   :  { %1263 = vmatmul.bf16.vlgmr.msra.gmra.mxu3 %v3967_v34  ;;  %1289 = vmatmul.bf16.vlgmr.msrb.gmra.mxu1 %v3967_v34  ;;  %v3631_v34 = vld [vmem:[#allocation9 + $0xb4] sm:$0xf0]  ;;  %v3265_v43 = vor.u32 %v3687_v37, %v3264_v36  ;;  %v3089_v36 = vor.u32 %v3643_v33, %v3088_v32  ;;  %v3216_v37 = vld [vmem:[#allocation9 + $0x210] sm:$0xf]  ;;  %v3729_v63 = vld [vmem:[#allocation9 + $0x3c4] sm:$0xf0] }
  0xfe   :  { %2149 = vmatpush.bf16.msrb.mxu3 %v3073_v35  ;;  %2175 = vmatpush.bf16.msra.mxu1 %v3201_v45  ;;  %v3041_v14 = vor.u32 %v3631_v34, %v3040_v2  ;;  %v3703_v35 = vld [vmem:[#allocation9 + $0x2f4] sm:$0xf0]  ;;  %v3256_v45 = vld [vmem:[#allocation9 + $0x260] sm:$0xf]  ;;  %v3661_v2 = vld [vmem:[#allocation9 + $0x1a4] sm:$0xf0] }
  0xff   :  { %v3329_v40 = vor.u32 %v3703_v35, %v3328_v31  ;;  %v3296_v34 = vld [vmem:[#allocation9 + $0x2b0] sm:$0xf]  ;;  %v3735_v31 = vld [vmem:[#allocation9 + $0x3f4] sm:$0xf0] }
 0x100   :  { %2137 = vmatpush.bf16.msrb.mxu2 %v3001_v48  ;;  %2163 = vmatpush.bf16.msra.mxu0 %v3129_v29  ;;  %v3160_v29 = vld [vmem:[#allocation9 + $0x1a0] sm:$0xf] }
 0x102   :  { %2150 = vmatpush.bf16.msrb.mxu3 %v3065_v46  ;;  %2176 = vmatpush.bf16.msra.mxu1 %v3193_v57  ;;  %v3685_v46 = vld [vmem:[#allocation9 + $0x264] sm:$0xf0]  ;;  %v3304_v57 = vld [vmem:[#allocation9 + $0x2c0] sm:$0xf] }
 0x103   :  { %v3257_v48 = vor.u32 %v3685_v46, %v3256_v45  ;;  %v3305_v0 = vor.u32 %v3697_v58, %v3304_v57  ;;  %v3733_v45 = vld [vmem:[#allocation9 + $0x3e4] sm:$0xf0]  ;;  %v3440_v57 = vld [vmem:[#allocation9 + $0x3d0] sm:$0xf]  ;;  %v3731_v58 = vld [vmem:[#allocation9 + $0x3d4] sm:$0xf0] }
 0x104   :  { %2138 = vmatpush.bf16.msrb.mxu2 %v2993_v60  ;;  %2164 = vmatpush.bf16.msra.mxu0 %v3121_v12  ;;  %v3112_v60 = vld [vmem:[#allocation9 + $0x140] sm:$0xf]  ;;  %v3152_v12 = vld [vmem:[#allocation9 + $0x190] sm:$0xf]  ;;  %v3449_v46 = vor.u32 %v3733_v45, %v3448_v44  ;;  %v3636_v44 = vld [vmem:[#allocation9 + $0xe4] sm:$0xf] }
 0x105   :  { %v3113_v62 = vor.u32 %v3649_v61, %v3112_v60  ;;  %v3384_v60 = vld [vmem:[#allocation9 + $0x360] sm:$0xf]  ;;  %v3717_v61 = vld [vmem:[#allocation9 + $0x364] sm:$0xf0]  ;;  %v3066_v45 = vld [vmem:[#allocation9 + $0xe8] sm:$0xf0] }
 0x106   :  { %2151 = vmatpush.bf16.msrb.mxu3 %v3057_v59  ;;  %2177 = vmatpush.bf16.msra.mxu1 %v3185_v3  ;;  %v3169_v59 = vor.u32 %v3663_v56, %v3168_v55  ;;  %v3695_v3 = vld [vmem:[#allocation9 + $0x2b4] sm:$0xf0]  ;;  %v3209_v55 = vor.u32 %v3673_v52, %v3208_v50  ;;  %v3622_v50 = vld [vmem:[#allocation9 + $0x74] sm:$0xf] }
 0x107   :  { %v3297_v10 = vor.u32 %v3695_v3, %v3296_v34  ;;  %v3990_v3 = vld [vmem:[%s4047_s5] sm:$0xff] }
 0x108   :  { %2139 = vmatpush.bf16.msrb.mxu2 %v2985_v5  ;;  %2165 = vmatpush.bf16.msra.mxu0 %v3113_v62  ;;  %v3104_v5 = vld [vmem:[#allocation9 + $0x130] sm:$0xf]  ;;  %v3385_v62 = vor.u32 %v3717_v61, %v3384_v60  ;;  %v1322_v33 = vperm.slane %v3990_v3, 0 }
 0x109   :  { %v3105_v7 = vor.u32 %v3647_v6, %v3104_v5  ;;  %v3727_v5 = vld [vmem:[#allocation9 + $0x3b4] sm:$0xf0] }
 0x10a   :  { %2152 = vmatpush.bf16.msrb.mxu3 %v3049_v4  ;;  %2178 = vmatpush.bf16.msra.mxu1 %v3177_v13  ;;  %v3161_v4 = vor.u32 %v3661_v2, %v3160_v29  ;;  %v3659_v13 = vld [vmem:[#allocation9 + $0x194] sm:$0xf0]  ;;  %v3376_v29 = vld [vmem:[#allocation9 + $0x350] sm:$0xf] }
 0x10b   :  { %v3715_v2 = vld [vmem:[#allocation9 + $0x354] sm:$0xf0] }
 0x10c   :  { %2140 = vmatpush.bf16.msrb.mxu2 %v2977_v16  ;;  %2166 = vmatpush.bf16.msra.mxu0 %v3105_v7  ;;  %v3153_v16 = vor.u32 %v3659_v13, %v3152_v12  ;;  %v3377_v34 = vor.u32 %v3715_v2, %v3376_v29  ;;  %v1323_v13 = vperm.slane %v3990_v3, 1  ;;  %v3620_v29 = vld [vmem:[#allocation9 + $0x64] sm:$0xf]  ;;  %v3002_v2 = vld [vmem:[#allocation9 + $0x68] sm:$0xf0] }
 0x10e   :  { %2153 = vmatpush.bf16.msrb.mxu3 %v3041_v14  ;;  %2179 = vmatpush.bf16.msra.mxu1 %v3169_v59  ;;  %v3288_v14 = vld [vmem:[#allocation9 + $0x2a0] sm:$0xf]  ;;  %v3441_v59 = vor.u32 %v3731_v58, %v3440_v57  ;;  %v3058_v58 = vld [vmem:[#allocation9 + $0xd8] sm:$0xf0] }
 0x110   :  { %2141 = vmatpush.bf16.msrb.mxu2 %v2969_v22  ;;  %v3289_v22 = vor.u32 %v3693_v15, %v3288_v14  ;;  %2167 = vmatpush.bf16.msra.mxu0 %v3097_v19  ;;  %v3416_v15 = vld [vmem:[#allocation9 + $0x3a0] sm:$0xf]  ;;  %v3360_v19 = vld [vmem:[#allocation9 + $0x330] sm:$0xf] }
 0x112   :  { %2154 = vmatpush.bf16.msrb.mxu3 %v3033_v20  ;;  %2180 = vmatpush.bf16.msra.mxu1 %v3161_v4  ;;  %v3224_v20 = vld [vmem:[#allocation9 + $0x220] sm:$0xf]  ;;  %v3424_v4 = vld [vmem:[#allocation9 + $0x3b0] sm:$0xf] }
 0x113   :  { %v3225_v23 = vor.u32 %v3677_v21, %v3224_v20  ;;  %v3425_v8 = vor.u32 %v3727_v5, %v3424_v4  ;;  %v3711_v20 = vld [vmem:[#allocation9 + $0x334] sm:$0xf0]  ;;  %v3336_v5 = vld [vmem:[#allocation9 + $0x300] sm:$0xf] }
 0x114   :  { %2142 = vmatpush.bf16.msrb.mxu2 %v2961_v30  ;;  %v3456_v30 = vld [vmem:[#allocation9 + $0x3f0] sm:$0xf]  ;;  %2168 = vmatpush.bf16.msra.mxu0 %v3089_v36 }
 0x115   :  { %v3457_v35 = vor.u32 %v3735_v31, %v3456_v30  ;;  %v3723_v30 = vld [vmem:[#allocation9 + $0x394] sm:$0xf0] }
 0x116   :  { %2155 = vmatpush.bf16.msrb.mxu3 %v3025_v26  ;;  %2181 = vmatpush.bf16.msra.mxu1 %v3153_v16  ;;  %v3280_v26 = vld [vmem:[#allocation9 + $0x290] sm:$0xf]  ;;  %v3725_v16 = vld [vmem:[#allocation9 + $0x3a4] sm:$0xf0] }
 0x117   :  { %v3417_v18 = vor.u32 %v3725_v16, %v3416_v15  ;;  %v2994_v15 = vld [vmem:[#allocation9 + $0x58] sm:$0xf0] }
 0x118   :  { %2143 = vmatpush.bf16.msrb.mxu2 %v2953_v39  ;;  %v3272_v39 = vld [vmem:[#allocation9 + $0x280] sm:$0xf] }
 0x119   :  { %v3273_v51 = vor.u32 %v3689_v41, %v3272_v39  ;;  %v3352_v39 = vld [vmem:[#allocation9 + $0x320] sm:$0xf] }
 0x11a   :  { %2156 = vmatpush.bf16.msrb.mxu3 %v3017_v38  ;;  %2182 = vmatpush.bf16.msra.mxu1 %v3145_v28  ;;  %v3281_v38 = vor.u32 %v3691_v27, %v3280_v26  ;;  %v3361_v26 = vor.u32 %v3711_v20, %v3360_v19  ;;  %v3408_v28 = vld [vmem:[#allocation9 + $0x390] sm:$0xf] }
 0x11b   :  { %v3409_v36 = vor.u32 %v3723_v30, %v3408_v28  ;;  %v1324_v28 = vperm.slane %v3990_v3, 2 }
 0x11c   :  { %2188 = vmatpush.bf16.msra.mxu2 %v3265_v43 }
 0x11e   :  { %2201 = vmatpush.bf16.msra.mxu3 %v3329_v40  ;;  %v3675_v40 = vld [vmem:[#allocation9 + $0x214] sm:$0xf0]  ;;  %2227 = vmatpush.bf16.msrb.mxu1 %v3457_v35 }
 0x11f   :  { %v3217_v43 = vor.u32 %v3675_v40, %v3216_v37  ;;  %v3709_v40 = vld [vmem:[#allocation9 + $0x324] sm:$0xf0] }
 0x120   :  { %2189 = vmatpush.bf16.msra.mxu2 %v3257_v48  ;;  %v3641_v48 = vld [vmem:[#allocation9 + $0x104] sm:$0xf0] }
 0x122   :  { %2202 = vmatpush.bf16.msra.mxu3 %v3321_v47  ;;  %v3080_v47 = vld [vmem:[#allocation9 + $0x100] sm:$0xf]  ;;  %2228 = vmatpush.bf16.msrb.mxu1 %v3449_v46  ;;  %v3353_v46 = vor.u32 %v3709_v40, %v3352_v39  ;;  %v3034_v40 = vld [vmem:[#allocation9 + $0xa8] sm:$0xf0] }
 0x123   :  { %v3081_v49 = vor.u32 %v3641_v48, %v3080_v47  ;;  %v3400_v47 = vld [vmem:[#allocation9 + $0x380] sm:$0xf]  ;;  %v3721_v48 = vld [vmem:[#allocation9 + $0x384] sm:$0xf0] }
 0x124   :  { %2190 = vmatpush.bf16.msra.mxu2 %v3249_v54  ;;  %v3719_v54 = vld [vmem:[#allocation9 + $0x374] sm:$0xf0]  ;;  %v3401_v52 = vor.u32 %v3721_v48, %v3400_v47  ;;  %v2978_v48 = vld [vmem:[#allocation9 + $0x38] sm:$0xf0] }
 0x125   :  { %2169 = vmatpush.bf16.msra.mxu0 %v3081_v49 }
 0x126   :  { %2203 = vmatpush.bf16.msra.mxu3 %v3313_v53  ;;  %v3392_v53 = vld [vmem:[#allocation9 + $0x370] sm:$0xf]  ;;  %2229 = vmatpush.bf16.msrb.mxu1 %v3441_v59  ;;  %v3707_v59 = vld [vmem:[#allocation9 + $0x314] sm:$0xf0] }
 0x127   :  { %v3393_v56 = vor.u32 %v3719_v54, %v3392_v53  ;;  %v3069_v53 = vor.u32 %v3636_v44, %v3066_v45  ;;  %v3634_v54 = vld [vmem:[#allocation9 + $0xd4] sm:$0xf]  ;;  %v3194_v44 = vld [vmem:[#allocation9 + $0x1e8] sm:$0xf0] }
 0x128   :  { %2191 = vmatpush.bf16.msra.mxu2 %v3241_v1  ;;  %v3985_v1 = vld [vmem:[#allocation7] sm:$0xff]  ;;  %v3061_v4 = vor.u32 %v3634_v54, %v3058_v58 }
 0x129   :  { %2214 = vmatpush.bf16.msrb.mxu0 %v3393_v56  ;;  %v1297_v7 = vperm.slane %v3985_v1, 1  ;;  %v1298_v16 = vperm.slane %v3985_v1, 2  ;;  %v3186_v58 = vld [vmem:[#allocation9 + $0x1d8] sm:$0xf0] }
 0x12a   :  { %2204 = vmatpush.bf16.msra.mxu3 %v3305_v0  ;;  %v3433_v0 = vor.u32 %v3729_v63, %v3432_v42 }
 0x12c   :  { %2192 = vmatpush.bf16.msra.mxu2 %v3233_v11  ;;  %2230 = vmatpush.bf16.msrb.mxu1 %v3433_v0  ;;  %v3713_v11 = vld [vmem:[#allocation9 + $0x344] sm:$0xf0]  ;;  %v1299_v0 = vperm.slane %v3985_v1, 3 }
 0x12d   :  { %2215 = vmatpush.bf16.msrb.mxu0 %v3385_v62 }
 0x12e   :  { %2205 = vmatpush.bf16.msra.mxu3 %v3297_v10  ;;  %v3368_v10 = vld [vmem:[#allocation9 + $0x340] sm:$0xf] }
 0x12f   :  { %v3369_v14 = vor.u32 %v3713_v11, %v3368_v10  ;;  %v3050_v10 = vld [vmem:[#allocation9 + $0xc8] sm:$0xf0] }
 0x130   :  { %2193 = vmatpush.bf16.msra.mxu2 %v3225_v23  ;;  %2231 = vmatpush.bf16.msrb.mxu1 %v3425_v8  ;;  %v1296_v23 = vperm.slane %v3985_v1, 0  ;;  %v1325_v8 = vperm.slane %v3990_v3, 3 }
 0x131   :  { %2216 = vmatpush.bf16.msrb.mxu0 %v3377_v34 }
 0x132   :  { %2206 = vmatpush.bf16.msra.mxu3 %v3289_v22 }
 0x134   :  { %2194 = vmatpush.bf16.msra.mxu2 %v3217_v43  ;;  %2232 = vmatpush.bf16.msrb.mxu1 %v3417_v18  ;;  %v3630_v18 = vld [vmem:[#allocation9 + $0xb4] sm:$0xf] }
 0x135   :  { %2217 = vmatpush.bf16.msrb.mxu0 %v3369_v14  ;;  %v3618_v14 = vld [vmem:[#allocation9 + $0x54] sm:$0xf] }
 0x136   :  { %2207 = vmatpush.bf16.msra.mxu3 %v3281_v38  ;;  %v3077_v38 = vor.u32 %v3638_v24, %v3074_v25  ;;  %v2997_v25 = vor.u32 %v3618_v14, %v2994_v15  ;;  %v3610_v14 = vld [vmem:[#allocation9 + $0x14] sm:$0xf] }
 0x137   :  { %v1121_v6 = vpop.f32.mrf.mxu0 }
 0x138   :  { %2195 = vmatpush.bf16.msra.mxu2 %v3209_v55  ;;  %2233 = vmatpush.bf16.msrb.mxu1 %v3409_v36  ;;  %v3344_v55 = vld [vmem:[#allocation9 + $0x310] sm:$0xf]  ;;  %v3628_v36 = vld [vmem:[#allocation9 + $0xa4] sm:$0xf] }
 0x139   :  { %2218 = vmatpush.bf16.msrb.mxu0 %v3361_v26  ;;  %v3345_v62 = vor.u32 %v3707_v59, %v3344_v55 }
 0x13a   :  { %2208 = vmatpush.bf16.msra.mxu3 %v3273_v51  ;;  %v1134_v9 = vpop.f32.mrf.mxu1  ;;  %v3010_v51 = vld [vmem:[#allocation9 + $0x78] sm:$0xf0] }
 0x13b   :  { %v1135_v12 = vadd.f32 %v1134_v9, %v1121_v6  ;;  %v3013_v61 = vor.u32 %v3622_v50, %v3010_v51  ;;  %v3705_v6 = vld [vmem:[#allocation9 + $0x304] sm:$0xf0]  ;;  %v3632_v9 = vld [vmem:[#allocation9 + $0xc4] sm:$0xf]  ;;  %v3138_v50 = vld [vmem:[#allocation9 + $0x178] sm:$0xf0]  ;;  %v3037_v51 = vor.u32 %v3628_v36, %v3034_v40 }
 0x13c   :  { %2234 = vmatpush.bf16.msrb.mxu1 %v3401_v52  ;;  %v3337_v11 = vor.u32 %v3705_v6, %v3336_v5  ;;  %v3626_v52 = vld [vmem:[#allocation9 + $0x94] sm:$0xf]  ;;  %v3624_v5 = vld [vmem:[#allocation9 + $0x84] sm:$0xf]  ;;  %v2954_v36 = vld [vmem:[#allocation9 + $0x8] sm:$0xf0] }
 0x13d   :  { %v1313_v17 = vmul.f32 %v1297_v7, %v1135_v12  ;;  %v1095_v22 = vpop.f32.mrf.mxu2  ;;  %2219 = vmatpush.bf16.msrb.mxu0 %v3353_v46  ;;  %v3005_v12 = vor.u32 %v3620_v29, %v3002_v2  ;;  %v3614_v46 = vld [vmem:[#allocation9 + $0x34] sm:$0xf]  ;;  %v3652_v29 = vld [vmem:[#allocation9 + $0x164] sm:$0xf]  ;;  %v3130_v2 = vld [vmem:[#allocation9 + $0x168] sm:$0xf0] }
 0x13e   :  { %v3133_v15 = vor.u32 %v3652_v29, %v3130_v2  ;;  %v3154_v29 = vld [vmem:[#allocation9 + $0x198] sm:$0xf0] }
 0x13f   :  { %v1339_v21 = vadd.f32 %v1323_v13, %v1313_v17  ;;  %v1123_v35 = vpop.f32.mrf.mxu0  ;;  %v3053_v17 = vor.u32 %v3632_v9, %v3050_v10  ;;  %v3178_v9 = vld [vmem:[#allocation9 + $0x1c8] sm:$0xf0] }
 0x140   :  { %v1108_v27 = vpop.f32.mrf.mxu3 }
 0x141   :  { %v1347_v31 = vmax.f32 %v1339_v21, 0.0  ;;  %v1109_v32 = vadd.f32 %v1108_v27, %v1095_v22  ;;  %2220 = vmatpush.bf16.msrb.mxu0 %v3345_v62  ;;  %v3042_v21 = vld [vmem:[#allocation9 + $0xb8] sm:$0xf0]  ;;  %v3670_v22 = vld [vmem:[#allocation9 + $0x1f4] sm:$0xf] }
 0x142   :  { %v1136_v37 = vpop.f32.mrf.mxu1  ;;  %v3045_v35 = vor.u32 %v3630_v18, %v3042_v21  ;;  %v3650_v18 = vld [vmem:[#allocation9 + $0x154] sm:$0xf] }
 0x143   :  { %v3996_v41 = vpack.c.bf16 %v1347_v31, %v1347_v31  ;;  %v1312_v43 = vmul.f32 %v1296_v23, %v1109_v32  ;;  %v3202_v23 = vld [vmem:[#allocation9 + $0x1f8] sm:$0xf0]  ;;  %v3616_v31 = vld [vmem:[#allocation9 + $0x44] sm:$0xf]  ;;  %v2986_v32 = vld [vmem:[#allocation9 + $0x48] sm:$0xf0] }
 0x144   :  { %v3205_v37 = vor.u32 %v3670_v22, %v3202_v23  ;;  %v2989_v45 = vor.u32 %v3616_v31, %v2986_v32  ;;  %v3662_v23 = vld [vmem:[#allocation9 + $0x1b4] sm:$0xf] }
 0x145   :  { %v1338_v49 = vadd.f32 %v1322_v33, %v1312_v43  ;;  %2157 = vmatmul.bf16.vlgmr.msrb.gmra.mxu3 %v3996_v41  ;;  %v1097_v57 = vpop.f32.mrf.mxu2  ;;  %2221 = vmatpush.bf16.msrb.mxu0 %v3337_v11  ;;  %v3668_v43 = vld [vmem:[#allocation9 + $0x1e4] sm:$0xf] }
 0x146   :  { %2253 = vmatpush.bf16.msrb.mxu3 %v3077_v38  ;;  %v3197_v54 = vor.u32 %v3668_v43, %v3194_v44  ;;  %v3666_v57 = vld [vmem:[#allocation9 + $0x1d4] sm:$0xf]  ;;  %v3648_v43 = vld [vmem:[#allocation9 + $0x144] sm:$0xf]  ;;  %v3114_v44 = vld [vmem:[#allocation9 + $0x148] sm:$0xf0] }
 0x147   :  { %v1346_v56 = vmax.f32 %v1338_v49, 0.0  ;;  %v3654_v49 = vld [vmem:[#allocation9 + $0x174] sm:$0xf]  ;;  %v3189_v6 = vor.u32 %v3666_v57, %v3186_v58  ;;  %v3117_v57 = vor.u32 %v3648_v43, %v3114_v44  ;;  %v3692_v44 = vld [vmem:[#allocation9 + $0x2a4] sm:$0xf] }
 0x148   :  { %v1110_v60 = vpop.f32.mrf.mxu3  ;;  %v1173_v63 = vpop.f32.mrf.mxu0  ;;  %v3141_v62 = vor.u32 %v3654_v49, %v3138_v50 }
 0x149   :  { %v3999_v42 = vpack.c.bf16 %v1346_v56, %v1346_v56  ;;  %v2981_v60 = vor.u32 %v3614_v46, %v2978_v48  ;;  %v3660_v46 = vld [vmem:[#allocation9 + $0x1a4] sm:$0xf] }
 0x14a   :  { %v1186_v34 = vpop.f32.mrf.mxu1  ;;  %2254 = vmatpush.bf16.msrb.mxu3 %v3069_v53  ;;  %v3026_v53 = vld [vmem:[#allocation9 + $0x98] sm:$0xf0] }
 0x14b   :  { %v1187_v7 = vadd.f32 %v1186_v34, %v1173_v63  ;;  %2144 = vmatmul.bf16.vlgmr.msrb.gmra.mxu2 %v3999_v42  ;;  %v1301_v34 = vperm.slane %v3985_v1, 5 }
 0x14c   :  { %2240 = vmatpush.bf16.msrb.mxu2 %v3013_v61  ;;  %v3612_v61 = vld [vmem:[#allocation9 + $0x24] sm:$0xf] }
 0x14d   :  { %v1315_v13 = vmul.f32 %v1299_v0, %v1187_v7  ;;  %v2970_v0 = vld [vmem:[#allocation9 + $0x28] sm:$0xf0] }
 0x14e   :  { %2255 = vmatpush.bf16.msrb.mxu3 %v3061_v4  ;;  %v1147_v20 = vpop.f32.mrf.mxu2  ;;  %v3029_v4 = vor.u32 %v3626_v52, %v3026_v53  ;;  %v3018_v7 = vld [vmem:[#allocation9 + $0x88] sm:$0xf0] }
 0x14f   :  { %v1341_v19 = vadd.f32 %v1325_v8, %v1315_v13  ;;  %v3664_v8 = vld [vmem:[#allocation9 + $0x1c4] sm:$0xf]  ;;  %v2973_v13 = vor.u32 %v3612_v61, %v2970_v0  ;;  %v3646_v61 = vld [vmem:[#allocation9 + $0x134] sm:$0xf] }
 0x150   :  { %v1160_v24 = vpop.f32.mrf.mxu3  ;;  %2241 = vmatpush.bf16.msrb.mxu2 %v3005_v12  ;;  %v1175_v30 = vpop.f32.mrf.mxu0  ;;  %v1327_v12 = vperm.slane %v3990_v3, 5  ;;  %v3181_v21 = vor.u32 %v3664_v8, %v3178_v9  ;;  %v3658_v0 = vld [vmem:[#allocation9 + $0x194] sm:$0xf]  ;;  %v3314_v8 = vld [vmem:[#allocation9 + $0x2d8] sm:$0xf0] }
 0x151   :  { %v1349_v26 = vmax.f32 %v1341_v19, 0.0  ;;  %v1161_v27 = vadd.f32 %v1160_v24, %v1147_v20  ;;  %v3122_v19 = vld [vmem:[#allocation9 + $0x158] sm:$0xf0]  ;;  %v3021_v20 = vor.u32 %v3624_v5, %v3018_v7  ;;  %v3698_v7 = vld [vmem:[#allocation9 + $0x2d4] sm:$0xf] }
 0x152   :  { %v1188_v33 = vpop.f32.mrf.mxu1  ;;  %2256 = vmatpush.bf16.msrb.mxu3 %v3053_v17  ;;  %v2962_v17 = vld [vmem:[#allocation9 + $0x18] sm:$0xf0]  ;;  %v3684_v9 = vld [vmem:[#allocation9 + $0x264] sm:$0xf] }
 0x153   :  { %v4006_v38 = vpack.c.bf16 %v1349_v26, %v1349_v26  ;;  %v1314_v39 = vmul.f32 %v1298_v16, %v1161_v27  ;;  %v3170_v24 = vld [vmem:[#allocation9 + $0x1b8] sm:$0xf0]  ;;  %v3702_v26 = vld [vmem:[#allocation9 + $0x2f4] sm:$0xf]  ;;  %v2965_v27 = vor.u32 %v3610_v14, %v2962_v17  ;;  %v3644_v14 = vld [vmem:[#allocation9 + $0x124] sm:$0xf] }
 0x154   :  { %2242 = vmatpush.bf16.msrb.mxu2 %v2997_v25  ;;  %v1300_v25 = vperm.slane %v3985_v1, 4  ;;  %v3330_v33 = vld [vmem:[#allocation9 + $0x2f8] sm:$0xf0]  ;;  %v3173_v40 = vor.u32 %v3662_v23, %v3170_v24  ;;  %v3146_v17 = vld [vmem:[#allocation9 + $0x188] sm:$0xf0] }
 0x155   :  { %v1340_v47 = vadd.f32 %v1324_v28, %v1314_v39  ;;  %2183 = vmatmul.bf16.vlgmr.msra.gmra.mxu1 %v4006_v38  ;;  %v3125_v28 = vor.u32 %v3650_v18, %v3122_v19  ;;  %v1326_v39 = vperm.slane %v3990_v3, 4  ;;  %v3317_v18 = vor.u32 %v3698_v7, %v3314_v8  ;;  %v3250_v24 = vld [vmem:[#allocation9 + $0x258] sm:$0xf0]  ;;  %v3674_v8 = vld [vmem:[#allocation9 + $0x214] sm:$0xf] }
 0x156   :  { %2257 = vmatpush.bf16.msrb.mxu3 %v3045_v35  ;;  %2279 = vmatpush.bf16.msra.mxu1 %v3205_v37  ;;  %v1149_v56 = vpop.f32.mrf.mxu2  ;;  %v3608_v35 = vld [vmem:[#allocation9 + $0x4] sm:$0xf]  ;;  %v3458_v7 = vld [vmem:[#allocation9 + $0x3f8] sm:$0xf0] }
 0x157   :  { %v1348_v55 = vmax.f32 %v1340_v47, 0.0  ;;  %v3162_v47 = vld [vmem:[#allocation9 + $0x1a8] sm:$0xf0]  ;;  %v2957_v52 = vor.u32 %v3608_v35, %v2954_v36  ;;  %v3686_v56 = vld [vmem:[#allocation9 + $0x274] sm:$0xf] }
 0x158   :  { %v1162_v59 = vpop.f32.mrf.mxu3  ;;  %2243 = vmatpush.bf16.msrb.mxu2 %v2989_v45  ;;  %v1225_v10 = vpop.f32.mrf.mxu0  ;;  %v3242_v36 = vld [vmem:[#allocation9 + $0x248] sm:$0xf0] }
 0x159   :  { %v4009_v63 = vpack.c.bf16 %v1348_v55, %v1348_v55  ;;  %v3322_v55 = vld [vmem:[#allocation9 + $0x2e8] sm:$0xf0]  ;;  %v3266_v59 = vld [vmem:[#allocation9 + $0x278] sm:$0xf0] }
 0x15a   :  { %2258 = vmatpush.bf16.msrb.mxu3 %v3037_v51  ;;  %2280 = vmatpush.bf16.msra.mxu1 %v3197_v54  ;;  %v1238_v11 = vpop.f32.mrf.mxu1  ;;  %v3333_v51 = vor.u32 %v3702_v26, %v3330_v33  ;;  %v3700_v54 = vld [vmem:[#allocation9 + $0x2e4] sm:$0xf]  ;;  %v3642_v26 = vld [vmem:[#allocation9 + $0x114] sm:$0xf] }
 0x15b   :  { %2170 = vmatmul.bf16.vlgmr.msra.gmra.mxu0 %v4009_v63  ;;  %v1239_v16 = vadd.f32 %v1238_v11, %v1225_v10  ;;  %v3680_v33 = vld [vmem:[#allocation9 + $0x244] sm:$0xf] }
 0x15c   :  { %2244 = vmatpush.bf16.msrb.mxu2 %v2981_v60  ;;  %2266 = vmatpush.bf16.msra.mxu0 %v3141_v62  ;;  %v3165_v60 = vor.u32 %v3660_v46, %v3162_v47  ;;  %v3106_v62 = vld [vmem:[#allocation9 + $0x138] sm:$0xf0]  ;;  %v3245_v43 = vor.u32 %v3680_v33, %v3242_v36  ;;  %v3678_v47 = vld [vmem:[#allocation9 + $0x234] sm:$0xf]  ;;  %v3716_v36 = vld [vmem:[#allocation9 + $0x364] sm:$0xf] }
 0x15d   :  { %v1317_v22 = vmul.f32 %v1301_v34, %v1239_v16  ;;  %v3325_v34 = vor.u32 %v3700_v54, %v3322_v55  ;;  %v3109_v10 = vor.u32 %v3646_v61, %v3106_v62  ;;  %v3656_v16 = vld [vmem:[#allocation9 + $0x184] sm:$0xf]  ;;  %v3690_v55 = vld [vmem:[#allocation9 + $0x294] sm:$0xf]  ;;  %v3442_v33 = vld [vmem:[#allocation9 + $0x3d8] sm:$0xf0] }
 0x15e   :  { %2259 = vmatpush.bf16.msrb.mxu3 %v3029_v4  ;;  %2281 = vmatpush.bf16.msra.mxu1 %v3189_v6  ;;  %v1199_v31 = vpop.f32.mrf.mxu2  ;;  %v3269_v6 = vor.u32 %v3686_v56, %v3266_v59  ;;  %v3282_v56 = vld [vmem:[#allocation9 + $0x298] sm:$0xf0]  ;;  %v3676_v59 = vld [vmem:[#allocation9 + $0x224] sm:$0xf] }
 0x15f   :  { %v1343_v30 = vadd.f32 %v1327_v12, %v1317_v22  ;;  %v3258_v12 = vld [vmem:[#allocation9 + $0x268] sm:$0xf0]  ;;  %v3682_v22 = vld [vmem:[#allocation9 + $0x254] sm:$0xf]  ;;  %v3285_v62 = vor.u32 %v3690_v55, %v3282_v56  ;;  %v3724_v55 = vld [vmem:[#allocation9 + $0x3a4] sm:$0xf] }
 0x160   :  { %2245 = vmatpush.bf16.msrb.mxu2 %v2973_v13  ;;  %2267 = vmatpush.bf16.msra.mxu0 %v3133_v15  ;;  %v1212_v32 = vpop.f32.mrf.mxu3  ;;  %v1227_v49 = vpop.f32.mrf.mxu0  ;;  %v3157_v13 = vor.u32 %v3658_v0, %v3154_v29  ;;  %v3098_v15 = vld [vmem:[#allocation9 + $0x128] sm:$0xf0]  ;;  %v3261_v19 = vor.u32 %v3684_v9, %v3258_v12  ;;  %v3688_v29 = vld [vmem:[#allocation9 + $0x284] sm:$0xf]  ;;  %v3218_v9 = vld [vmem:[#allocation9 + $0x218] sm:$0xf0] }
 0x161   :  { %v1213_v37 = vadd.f32 %v1212_v32, %v1199_v31  ;;  %v1351_v45 = vmax.f32 %v1343_v30, 0.0  ;;  %v3101_v23 = vor.u32 %v3644_v14, %v3098_v15  ;;  %v3253_v30 = vor.u32 %v3682_v22, %v3250_v24  ;;  %v3694_v31 = vld [vmem:[#allocation9 + $0x2b4] sm:$0xf]  ;;  %v3298_v32 = vld [vmem:[#allocation9 + $0x2b8] sm:$0xf0] }
 0x162   :  { %2260 = vmatpush.bf16.msrb.mxu3 %v3021_v20  ;;  %2282 = vmatpush.bf16.msra.mxu1 %v3181_v21  ;;  %v1240_v50 = vpop.f32.mrf.mxu1  ;;  %v3696_v20 = vld [vmem:[#allocation9 + $0x2c4] sm:$0xf]  ;;  %v3306_v21 = vld [vmem:[#allocation9 + $0x2c8] sm:$0xf0]  ;;  %v1303_v49 = vperm.slane %v3985_v1, 7  ;;  %v1328_v12 = vperm.slane %v3990_v3, 6 }
 0x163   :  { %v1316_v48 = vmul.f32 %v1300_v25, %v1213_v37  ;;  %v4016_v53 = vpack.c.bf16 %v1351_v45, %v1351_v45  ;;  %v3149_v25 = vor.u32 %v3656_v16, %v3146_v17  ;;  %v3640_v37 = vld [vmem:[#allocation9 + $0x104] sm:$0xf]  ;;  %v3290_v45 = vld [vmem:[#allocation9 + $0x2a8] sm:$0xf0]  ;;  %v3221_v17 = vor.u32 %v3674_v8, %v3218_v9  ;;  %v3718_v24 = vld [vmem:[#allocation9 + $0x374] sm:$0xf] }
 0x164   :  { %2246 = vmatpush.bf16.msrb.mxu2 %v2965_v27  ;;  %2268 = vmatpush.bf16.msra.mxu0 %v3125_v28  ;;  %v3090_v27 = vld [vmem:[#allocation9 + $0x118] sm:$0xf0]  ;;  %v3309_v28 = vor.u32 %v3696_v20, %v3306_v21  ;;  %v3293_v50 = vor.u32 %v3692_v44, %v3290_v45  ;;  %v3450_v20 = vld [vmem:[#allocation9 + $0x3e8] sm:$0xf0]  ;;  %v3672_v21 = vld [vmem:[#allocation9 + $0x204] sm:$0xf] }
 0x165   :  { %v1342_v58 = vadd.f32 %v1326_v39, %v1316_v48  ;;  %2209 = vmatmul.bf16.vlgmr.msra.gmra.mxu3 %v4016_v53  ;;  %v3093_v35 = vor.u32 %v3642_v26, %v3090_v27  ;;  %v3082_v39 = vld [vmem:[#allocation9 + $0x108] sm:$0xf0]  ;;  %v3234_v48 = vld [vmem:[#allocation9 + $0x238] sm:$0xf0]  ;;  %v3714_v45 = vld [vmem:[#allocation9 + $0x354] sm:$0xf] }
 0x166   :  { %2283 = vmatpush.bf16.msra.mxu1 %v3173_v40  ;;  %2305 = vmatpush.bf16.msra.mxu3 %v3333_v51  ;;  %v1201_v4 = vpop.f32.mrf.mxu2  ;;  %v3301_v40 = vor.u32 %v3694_v31, %v3298_v32  ;;  %v3085_v46 = vor.u32 %v3640_v37, %v3082_v39  ;;  %v3237_v54 = vor.u32 %v3678_v47, %v3234_v48  ;;  %v3730_v32 = vld [vmem:[#allocation9 + $0x3d4] sm:$0xf]  ;;  %v3386_v37 = vld [vmem:[#allocation9 + $0x368] sm:$0xf0] }
 0x167   :  { %v1350_v2 = vmax.f32 %v1342_v58, 0.0  ;;  %v1329_v58 = vperm.slane %v3990_v3, 7  ;;  %v3445_v39 = vor.u32 %v3730_v32, %v3442_v33  ;;  %v3434_v44 = vld [vmem:[#allocation9 + $0x3c8] sm:$0xf0] }
 0x168   :  { %2247 = vmatpush.bf16.msrb.mxu2 %v2957_v52  ;;  %v1214_v5 = vpop.f32.mrf.mxu3  ;;  %2269 = vmatpush.bf16.msra.mxu0 %v3117_v57  ;;  %v3418_v56 = vld [vmem:[#allocation9 + $0x3a8] sm:$0xf0] }
 0x169   :  { %v4019_v11 = vpack.c.bf16 %v1350_v2, %v1350_v2  ;;  %v3274_v2 = vld [vmem:[#allocation9 + $0x288] sm:$0xf0] }
 0x16a   :  { %2284 = vmatpush.bf16.msra.mxu1 %v3165_v60  ;;  %2306 = vmatpush.bf16.msra.mxu3 %v3325_v34  ;;  %v3226_v60 = vld [vmem:[#allocation9 + $0x228] sm:$0xf0]  ;;  %v3734_v34 = vld [vmem:[#allocation9 + $0x3f4] sm:$0xf] }
 0x16b   :  { %2196 = vmatmul.bf16.vlgmr.msra.gmra.mxu2 %v4019_v11  ;;  %v3229_v0 = vor.u32 %v3676_v59, %v3226_v60  ;;  %v3461_v16 = vor.u32 %v3734_v34, %v3458_v7  ;;  %v3421_v59 = vor.u32 %v3724_v55, %v3418_v56  ;;  %v3722_v60 = vld [vmem:[#allocation9 + $0x394] sm:$0xf]  ;;  %v3402_v34 = vld [vmem:[#allocation9 + $0x388] sm:$0xf0]  ;;  %v3704_v7 = vld [vmem:[#allocation9 + $0x304] sm:$0xf] }
 0x16c   :  { %2292 = vmatpush.bf16.msra.mxu2 %v3269_v6  ;;  %2270 = vmatpush.bf16.msra.mxu0 %v3109_v10  ;;  %v3338_v8 = vld [vmem:[#allocation9 + $0x308] sm:$0xf0] }
 0x16d   :  { %v3341_v9 = vor.u32 %v3704_v7, %v3338_v8 }
 0x16e   :  { %2285 = vmatpush.bf16.msra.mxu1 %v3157_v13  ;;  %2307 = vmatpush.bf16.msra.mxu3 %v3317_v18 }
 0x170   :  { %2293 = vmatpush.bf16.msra.mxu2 %v3261_v19  ;;  %2271 = vmatpush.bf16.msra.mxu0 %v3101_v23  ;;  %v3732_v19 = vld [vmem:[#allocation9 + $0x3e4] sm:$0xf]  ;;  %v3210_v23 = vld [vmem:[#allocation9 + $0x208] sm:$0xf0] }
 0x171   :  { %v3453_v26 = vor.u32 %v3732_v19, %v3450_v20 }
 0x172   :  { %2286 = vmatpush.bf16.msra.mxu1 %v3149_v25  ;;  %2308 = vmatpush.bf16.msra.mxu3 %v3309_v28  ;;  %v3394_v25 = vld [vmem:[#allocation9 + $0x378] sm:$0xf0] }
 0x173   :  { %v3397_v31 = vor.u32 %v3718_v24, %v3394_v25 }
 0x174   :  { %2294 = vmatpush.bf16.msra.mxu2 %v3253_v30  ;;  %2272 = vmatpush.bf16.msra.mxu0 %v3093_v35  ;;  %v3213_v30 = vor.u32 %v3672_v21, %v3210_v23 }
 0x175   :  { %2261 = vmatmul.bf16.vlgmr.msrb.gmra.mxu3 %v3996_v41  ;;  %v1302_v41 = vperm.slane %v3985_v1, 6 }
 0x176   :  { %2309 = vmatpush.bf16.msra.mxu3 %v3301_v40  ;;  %v3389_v40 = vor.u32 %v3716_v36, %v3386_v37 }
 0x178   :  { %v1277_v51 = vpop.f32.mrf.mxu0  ;;  %2295 = vmatpush.bf16.msra.mxu2 %v3245_v43  ;;  %2273 = vmatpush.bf16.msra.mxu0 %v3085_v46  ;;  %v3728_v43 = vld [vmem:[#allocation9 + $0x3c4] sm:$0xf]  ;;  %v3378_v46 = vld [vmem:[#allocation9 + $0x358] sm:$0xf0] }
 0x179   :  { %v3437_v47 = vor.u32 %v3728_v43, %v3434_v44  ;;  %v3381_v48 = vor.u32 %v3714_v45, %v3378_v46 }
 0x17a   :  { %v1290_v52 = vpop.f32.mrf.mxu1  ;;  %2310 = vmatpush.bf16.msra.mxu3 %v3293_v50  ;;  %v3712_v50 = vld [vmem:[#allocation9 + $0x344] sm:$0xf] }
 0x17b   :  { %v1291_v57 = vadd.f32 %v1290_v52, %v1277_v51  ;;  %2248 = vmatmul.bf16.vlgmr.msrb.gmra.mxu2 %v3999_v42  ;;  %v3277_v42 = vor.u32 %v3688_v29, %v3274_v2  ;;  %v3370_v51 = vld [vmem:[#allocation9 + $0x348] sm:$0xf0]  ;;  %v3720_v2 = vld [vmem:[#allocation9 + $0x384] sm:$0xf] }
 0x17c   :  { %2296 = vmatpush.bf16.msra.mxu2 %v3237_v54  ;;  %v3373_v54 = vor.u32 %v3712_v50, %v3370_v51 }
 0x17d   :  { %v1319_v61 = vmul.f32 %v1303_v49, %v1291_v57  ;;  %v3726_v49 = vld [vmem:[#allocation9 + $0x3b4] sm:$0xf] }
 0x17e   :  { %v1251_v5 = vpop.f32.mrf.mxu2  ;;  %2311 = vmatpush.bf16.msra.mxu3 %v3285_v62  ;;  %v3710_v57 = vld [vmem:[#allocation9 + $0x334] sm:$0xf]  ;;  %v3354_v62 = vld [vmem:[#allocation9 + $0x328] sm:$0xf0] }
 0x17f   :  { %v1345_v4 = vadd.f32 %v1329_v58, %v1319_v61  ;;  %v3362_v58 = vld [vmem:[#allocation9 + $0x338] sm:$0xf0] }
 0x180   :  { %v1264_v6 = vpop.f32.mrf.mxu3  ;;  %v1279_v1 = vpop.f32.mrf.mxu0  ;;  %2297 = vmatpush.bf16.msra.mxu2 %v3229_v0  ;;  %v3410_v61 = vld [vmem:[#allocation9 + $0x398] sm:$0xf0] }
 0x181   :  { %v1265_v10 = vadd.f32 %v1264_v6, %v1251_v5  ;;  %v1353_v13 = vmax.f32 %v1345_v4, 0.0  ;;  %v3413_v0 = vor.u32 %v3722_v60, %v3410_v61  ;;  %v3706_v4 = vld [vmem:[#allocation9 + $0x314] sm:$0xf]  ;;  %v3346_v5 = vld [vmem:[#allocation9 + $0x318] sm:$0xf0] }
 0x182   :  { %v1292_v15 = vpop.f32.mrf.mxu1  ;;  %2312 = vmatpush.bf16.msra.mxu3 %v3277_v42  ;;  %v3349_v6 = vor.u32 %v3706_v4, %v3346_v5 }
 0x183   :  { %v1318_v14 = vmul.f32 %v1302_v41, %v1265_v10  ;;  %v4028_v18 = vpack.c.bf16 %v1353_v13, %v1353_v13  ;;  %v3708_v41 = vld [vmem:[#allocation9 + $0x324] sm:$0xf]  ;;  %v1490_v10 = vld [vmem:[%s4049_s7] sm:$0x3] }
 0x184   :  { %2298 = vmatpush.bf16.msra.mxu2 %v3221_v17  ;;  %v3357_v29 = vor.u32 %v3708_v41, %v3354_v62  ;;  %v1493_v36 = vperm.slane %v1490_v10, 1 }
 0x185   :  { %v1344_v22 = vadd.f32 %v1328_v12, %v1318_v14  ;;  %2235 = vmatmul.bf16.vlgmr.msrb.gmra.mxu1 %v4028_v18  ;;  %2313 = vmatmul.bf16.vlgmr.msra.gmra.mxu3 %v4016_v53  ;;  %v3426_v53 = vld [vmem:[#allocation9 + $0x3b8] sm:$0xf0]  ;;  %v1492_v12 = vperm.slane %v1490_v10, 0 }
 0x186   :  { %2331 = vmatpush.bf16.msrb.mxu1 %v3461_v16  ;;  %v1253_v27 = vpop.f32.mrf.mxu2  ;;  %v3429_v52 = vor.u32 %v3726_v49, %v3426_v53 }
 0x187   :  { %v1352_v3 = vmax.f32 %v1344_v22, 0.0 }
 0x188   :  { %v1266_v28 = vpop.f32.mrf.mxu3  ;;  %2299 = vmatpush.bf16.msra.mxu2 %v3213_v30 }
 0x189   :  { %v1360_v35 = vpack.c.bf16 %v1352_v3, %v1352_v3 }
 0x18a   :  { %2332 = vmatpush.bf16.msrb.mxu1 %v3453_v26 }
 0x18b   :  { %2222 = vmatmul.bf16.vlgmr.msrb.gmra.mxu0 %v1360_v35  ;;  %2300 = vmatmul.bf16.vlgmr.msra.gmra.mxu2 %v4019_v11  ;;  %v3365_v11 = vor.u32 %v3710_v57, %v3362_v58 }
 0x18c   :  { %2318 = vmatpush.bf16.msrb.mxu0 %v3397_v31 }
 0x18e   :  { %2333 = vmatpush.bf16.msrb.mxu1 %v3445_v39 }
 0x190   :  { %2319 = vmatpush.bf16.msrb.mxu0 %v3389_v40 }
 0x192   :  { %2334 = vmatpush.bf16.msrb.mxu1 %v3437_v47 }
 0x194   :  { %2320 = vmatpush.bf16.msrb.mxu0 %v3381_v48 }
 0x195   :  { %2287 = vmatmul.bf16.vlgmr.msra.gmra.mxu1 %v4006_v38  ;;  %v3405_v38 = vor.u32 %v3720_v2, %v3402_v34 }
 0x196   :  { %2335 = vmatpush.bf16.msrb.mxu1 %v3429_v52 }
 0x198   :  { %2321 = vmatpush.bf16.msrb.mxu0 %v3373_v54 }
 0x19a   :  { %2336 = vmatpush.bf16.msrb.mxu1 %v3421_v59 }
 0x19b   :  { %2274 = vmatmul.bf16.vlgmr.msra.gmra.mxu0 %v4009_v63 }
 0x19c   :  { %2322 = vmatpush.bf16.msrb.mxu0 %v3365_v11 }
 0x19e   :  { %2337 = vmatpush.bf16.msrb.mxu1 %v3413_v0 }
 0x1a0   :  { %2323 = vmatpush.bf16.msrb.mxu0 %v3357_v29 }
 0x1a2   :  { %2338 = vmatpush.bf16.msrb.mxu1 %v3405_v38 }
 0x1a4   :  { %2324 = vmatpush.bf16.msrb.mxu0 %v3349_v6 }
 0x1a5   :  { %2339 = vmatmul.bf16.vlgmr.msrb.gmra.mxu1 %v4028_v18 }
 0x1a8   :  { %2325 = vmatpush.bf16.msrb.mxu0 %v3341_v9 }
 0x1ab   :  { %2326 = vmatmul.bf16.vlgmr.msrb.gmra.mxu0 %v1360_v35 }
 0x1c8   :  { %v2158_v63 = vpop.f32.mrf.mxu3 }
 0x1ce   :  { %v2145_v13 = vpop.f32.mrf.mxu2 }
 0x1cf   :  { %v2146_v42 = vadd.f32 %v2145_v13, %v1492_v12 }
 0x1d0   :  { %v2160_v14 = vpop.f32.mrf.mxu3 }
 0x1d1   :  { %v2159_v1 = vadd.f32 %v2158_v63, %v2146_v42 }
 0x1d2   :  { %v2184_v15 = vpop.f32.mrf.mxu1 }
 0x1d6   :  { %v2147_v16 = vpop.f32.mrf.mxu2 }
 0x1d8   :  { %v2171_v17 = vpop.f32.mrf.mxu0 }
 0x1d9   :  { %v2172_v19 = vadd.f32 %v2171_v17, %v2159_v1 }
 0x1da   :  { %v2186_v20 = vpop.f32.mrf.mxu1 }
 0x1db   :  { %v2185_v21 = vadd.f32 %v2184_v15, %v2172_v19 }
 0x1e0   :  { %v2173_v22 = vpop.f32.mrf.mxu0 }
 0x1e8   :  { %v2210_v18 = vpop.f32.mrf.mxu3 }
 0x1ee   :  { %v2197_v23 = vpop.f32.mrf.mxu2 }
 0x1ef   :  { %v2198_v50 = vadd.f32 %v2197_v23, %v2185_v21 }
 0x1f0   :  { %v2212_v24 = vpop.f32.mrf.mxu3 }
 0x1f1   :  { %v2211_v54 = vadd.f32 %v2210_v18, %v2198_v50 }
 0x1f6   :  { %v2199_v25 = vpop.f32.mrf.mxu2 }
 0x1f8   :  { %v2262_v3 = vpop.f32.mrf.mxu3 }
 0x1fe   :  { %v2249_v26 = vpop.f32.mrf.mxu2 }
 0x1ff   :  { %v2250_v43 = vadd.f32 %v2249_v26, %v1493_v36 }
 0x200   :  { %v2264_v28 = vpop.f32.mrf.mxu3 }
 0x201   :  { %v2263_v45 = vadd.f32 %v2262_v3, %v2250_v43 }
 0x202   :  { %v2236_v27 = vpop.f32.mrf.mxu1 }
 0x206   :  { %v2251_v31 = vpop.f32.mrf.mxu2 }
 0x208   :  { %v2223_v30 = vpop.f32.mrf.mxu0  ;;  %v2314_v33 = vpop.f32.mrf.mxu3 }
 0x209   :  { %v2224_v55 = vadd.f32 %v2223_v30, %v2211_v54 }
 0x20a   :  { %v2238_v32 = vpop.f32.mrf.mxu1 }
 0x20b   :  { %v2237_v59 = vadd.f32 %v2236_v27, %v2224_v55 }
 0x20e   :  { %v2301_v37 = vpop.f32.mrf.mxu2 }
 0x210   :  { %v2225_v35 = vpop.f32.mrf.mxu0  ;;  %v2316_v40 = vpop.f32.mrf.mxu3 }
 0x212   :  { %v2288_v39 = vpop.f32.mrf.mxu1 }
 0x216   :  { %v2303_v46 = vpop.f32.mrf.mxu2 }
 0x218   :  { %v2275_v44 = vpop.f32.mrf.mxu0 }
 0x219   :  { %v2276_v47 = vadd.f32 %v2275_v44, %v2263_v45 }
 0x21a   :  { %v2290_v48 = vpop.f32.mrf.mxu1 }
 0x21b   :  { %v2289_v49 = vadd.f32 %v2288_v39, %v2276_v47 }
 0x21d   :  { %v2302_v52 = vadd.f32 %v2301_v37, %v2289_v49 }
 0x21f   :  { %v2315_v56 = vadd.f32 %v2314_v33, %v2302_v52 }
 0x220   :  { %v2277_v53 = vpop.f32.mrf.mxu0 }
 0x222   :  { %v2340_v51 = vpop.f32.mrf.mxu1 }
 0x228   :  { %v2327_v57 = vpop.f32.mrf.mxu0 }
 0x229   :  { %v2328_v58 = vadd.f32 %v2327_v57, %v2315_v56 }
 0x22a   :  { %v2342_v60 = vpop.f32.mrf.mxu1 }
 0x22b   :  { %v2341_v11 = vadd.f32 %v2340_v51, %v2328_v58 }
 0x22d   :  { %3747 = vtanh.f32 %v2341_v11 }
 0x22e   :  { %3749 = vtanh.f32 %v2237_v59 }
 0x230   :  { %v2329_v61 = vpop.f32.mrf.mxu0 }
 0x233   :  { %v3748_v41 = vpop.eup %3747 }
 0x234   :  { %v2348_v62 = vrot.slane %v3748_v41, 6  ;;  %v3750_v0 = vpop.eup %3749 }
 0x236   :  { %v2350_v29 = vsel %vm2349_vm1, %v3750_v0, %v2348_v62 }
 0x237   :  { %2352 = vst [vmem:[%s4050_s8] sm:$0xf] %v2350_v29 }
 0x238   :  { %2357 = vsyncpa [#allocation3], 1 }
 0x239   :  { %2358 = vsyncpa [#allocation5], 1 }
 0x23a   :  { %2359 = vsyncpa [#allocation8], 1 }

</bundles_post_ra>
